<compile_context>
chip_gen: v7x
topology: tpu7x:2x2x1
jax: 0.10.0
libtpu: 0.0.40
codegen_flags: <defaults>
</compile_context>

<pallas_src>
import functools

import jax
import jax.numpy as jnp
import numpy as np
from jax.experimental import pallas as pl
from jax.experimental.pallas import tpu as pltpu

EPS = 1e-5  # nn.InstanceNorm2d default eps


def _double_conv_kernel(x2_ref, x1_ref, mask_ref,
                        w1a_ref, w1b_ref, g1_ref, b1_ref,
                        w2_ref, g2_ref, b2_ref,
                        out_ref, *, Wp, inv_hw):
    # Layout: channels on sublanes, flattened *padded* spatial axis on lanes
    # (S = Hp*Wp rounded up to a multiple of 128).  Inputs arrive with a zero
    # 1-px halo and a zero lane tail, so every 3x3 tap at an interior pixel
    # reads valid data.
    #
    # x2_ref : (c2, S)          skip-path tile
    # x1_ref : (c1, S)          upsampled deep-path tile
    # mask   : (1,  S) f32      1.0 at interior pixels, 0.0 at halo / tail
    # w1a    : (9, Cmid, c2)    conv1 weights for the x2 channels, tap-major
    # w1b    : (9, Cmid, c1)    conv1 weights for the x1 channels, tap-major
    # w2     : (9, Cout, Cmid)  conv2 weights, tap-major
    # g*/b*  : (C, 1) f32       InstanceNorm affine parameters
    # out    : (Cout, S)        lane-dense output slab (halo/tail written as 0)
    mask = mask_ref[...]
    sp = mask.shape[-1]

    def tap_shift(x, dy, dx):
        # out[:, p] = x[:, p + dy*Wp + dx] for interior p.  Implemented as a
        # single XLU lane rotate; the wrap-around only contaminates halo/tail
        # positions, which are re-masked after each norm.
        s = (-(dy * Wp + dx)) % sp
        if s == 0:
            return x
        return pltpu.roll(x, s, axis=1)

    def conv3x3(w_ref, x):
        # 9 accumulating tap dots -- no (9*C, S) im2col slab is materialized.
        acc = None
        for ky in range(3):
            for kx in range(3):
                d = jnp.dot(w_ref[ky * 3 + kx], tap_shift(x, ky - 1, kx - 1),
                            preferred_element_type=jnp.float32)
                acc = d if acc is None else acc + d
        return acc  # (C_out, S) f32

    def inorm_relu(acc, g, b):
        # Fused single-sweep InstanceNorm statistics over interior pixels only
        # (biased variance, eps inside rsqrt), then one normalize+affine+ReLU
        # sweep.  All norm math stays f32.  The trailing *mask re-zeroes the
        # halo/tail so it acts as the next conv's zero padding -- do not drop it.
        xm = acc * mask
        mean = jnp.sum(xm, axis=1, keepdims=True) * inv_hw          # (C, 1)
        ex2 = jnp.sum(xm * acc, axis=1, keepdims=True) * inv_hw     # (C, 1)
        var = ex2 - mean * mean
        scale = g * jax.lax.rsqrt(var + EPS)                        # (C, 1)
        off = b - mean * scale                                      # (C, 1)
        return jnp.maximum(acc * scale + off, 0.0) * mask

    # conv1: torch.cat([x2, x1], dim=1) is never materialized -- the weight
    # matrix is split per input and both contributions accumulate in f32.
    acc1 = conv3x3(w1a_ref, x2_ref[...]) + conv3x3(w1b_ref, x1_ref[...])
    y1 = inorm_relu(acc1, g1_ref[...], b1_ref[...])                 # (Cmid, S) f32

    # conv2
    acc2 = conv3x3(w2_ref, y1.astype(w2_ref.dtype))
    y2 = inorm_relu(acc2, g2_ref[...], b2_ref[...])                 # (Cout, S) f32

    out_ref[...] = y2.astype(out_ref.dtype)


def up_forward(x1, x2, params, *, compute_dtype=jnp.bfloat16):
    """Pallas version of Up.forward.  x1, x2 are NCHW; params are torch-layout.

    compute_dtype only affects the conv matmul operands (activations/weights);
    accumulation, InstanceNorm math and the output stay float32.  bf16 is the
    default: it halves HBM/VMEM bytes for this bandwidth-bound op and feeds the
    bf16 MXU at full rate on v6e/v7x (on v5e the elementwise math is f32 either
    way, so only the operand DMAs shrink).  Pass jnp.float32 for exact math.
    """
    w1, g1, b1, w2, g2, b2 = params              # w: (Cout, Cin, 3, 3); g/b: (C,)
    N, c1 = x1.shape[0], x1.shape[1]
    c2 = x2.shape[1]
    cin = c1 + c2
    cmid = w1.shape[0]
    cout = w2.shape[0]
    assert w1.shape[1] == cin and w2.shape[1] == cmid

    # nn.Upsample(scale_factor=2) -> default mode='nearest'.
    x1u = jnp.repeat(jnp.repeat(x1, 2, axis=2), 2, axis=3)
    H, W = x1u.shape[2], x1u.shape[3]
    diffX = H - x2.shape[2]
    diffY = W - x2.shape[3]

    # F.pad(x2, (diffY//2, diffY/2, diffX//2, diffX/2)) fused with the conv
    # padding=1 halo into a single pad per input.
    x2p = jnp.pad(x2, ((0, 0), (0, 0),
                       (1 + diffX // 2, 1 + int(diffX / 2)),
                       (1 + diffY // 2, 1 + int(diffY / 2))))
    x1p = jnp.pad(x1u, ((0, 0), (0, 0), (1, 1), (1, 1)))
    if x2p.shape[2:] != x1p.shape[2:]:
        raise ValueError("unsupported x1/x2 spatial combination (odd/negative diff)")

    Hp, Wp = H + 2, W + 2
    Sp = Hp * Wp
    Sp_pad = ((Sp + 127) // 128) * 128           # lane-dense flat spatial axis

    # Flattened, lane-aligned padded inputs: channels on sublanes, spatial on lanes.
    x2f = jnp.pad(x2p.reshape(N, c2, Sp),
                  ((0, 0), (0, 0), (0, Sp_pad - Sp))).astype(compute_dtype)
    x1f = jnp.pad(x1p.reshape(N, c1, Sp),
                  ((0, 0), (0, 0), (0, Sp_pad - Sp))).astype(compute_dtype)

    # Interior mask (trace-time numpy constant).
    m = np.zeros((Hp, Wp), np.float32)
    m[1:H + 1, 1:W + 1] = 1.0
    mask = jnp.asarray(np.pad(m.reshape(1, Sp), ((0, 0), (0, Sp_pad - Sp))))

    # Conv weights as per-tap (9, Cout, Cin) matmul operands (tap-major,
    # k = ky*3 + kx).  conv1 is split into x2-channel and x1-channel halves so
    # the kernel never concatenates the two inputs along the sublane axis.
    # torch.cat([x2, x1], dim=1): input channels [0:c2) <- x2, [c2:cin) <- x1.
    def tapify(w):   # (O, I, 3, 3) -> (9, O, I)
        return jnp.transpose(w, (2, 3, 0, 1)).reshape(9, w.shape[0], w.shape[1])

    w1a = tapify(w1[:, :c2]).astype(compute_dtype)
    w1b = tapify(w1[:, c2:]).astype(compute_dtype)
    w2t = tapify(w2).astype(compute_dtype)
    g1c = g1.reshape(cmid, 1).astype(jnp.float32)
    b1c = b1.reshape(cmid, 1).astype(jnp.float32)
    g2c = g2.reshape(cout, 1).astype(jnp.float32)
    b2c = b2.reshape(cout, 1).astype(jnp.float32)

    kernel = functools.partial(_double_conv_kernel, Wp=Wp, inv_hw=1.0 / (H * W))

    # VMEM budget sized to the actual (double-buffered) blocks plus headroom for
    # the f32 accumulators and per-tap rolled tiles; clamp to 64 MiB (v7x physical).
    ib = jnp.dtype(compute_dtype).itemsize
    block_bytes = (2 * cin * Sp_pad * ib                 # double-buffered inputs
                   + 2 * cout * Sp_pad * 4               # double-buffered output
                   + 9 * (cmid * cin + cout * cmid) * ib  # weights
                   + (cmid + cout) * Sp_pad * 4          # f32 accumulators
                   + 3 * cin * Sp_pad * ib               # rolled-tap staging
                   + Sp_pad * 4)                         # mask
    vmem_limit = int(min(64 * 1024 * 1024, max(8 * 1024 * 1024, 4 * block_bytes)))

    cost = pl.CostEstimate(
        flops=2 * N * Sp * 9 * (cin * cmid + cmid * cout),
        transcendentals=N * (cmid + cout),
        bytes_accessed=int((x2f.size + x1f.size) * ib
                           + N * cout * Sp_pad * 4
                           + 9 * (cmid * cin + cout * cmid) * ib),
    )

    out_flat = pl.pallas_call(
        kernel,
        out_shape=jax.ShapeDtypeStruct((N, cout, Sp_pad), jnp.float32),
        grid_spec=pltpu.PrefetchScalarGridSpec(
            num_scalar_prefetch=0,
            grid=(N,),
            in_specs=[
                pl.BlockSpec((None, c2, Sp_pad), lambda n: (n, 0, 0)),
                pl.BlockSpec((None, c1, Sp_pad), lambda n: (n, 0, 0)),
                pl.BlockSpec((1, Sp_pad), lambda n: (0, 0)),
                pl.BlockSpec((9, cmid, c2), lambda n: (0, 0, 0)),
                pl.BlockSpec((9, cmid, c1), lambda n: (0, 0, 0)),
                pl.BlockSpec((cmid, 1), lambda n: (0, 0)),
                pl.BlockSpec((cmid, 1), lambda n: (0, 0)),
                pl.BlockSpec((9, cout, cmid), lambda n: (0, 0, 0)),
                pl.BlockSpec((cout, 1), lambda n: (0, 0)),
                pl.BlockSpec((cout, 1), lambda n: (0, 0)),
            ],
            out_specs=pl.BlockSpec((None, cout, Sp_pad), lambda n: (n, 0, 0)),
        ),
        compiler_params=pltpu.CompilerParams(
            dimension_semantics=("parallel",),
            vmem_limit_bytes=vmem_limit,
        ),
        cost_estimate=cost,
    )(x2f, x1f, mask, w1a, w1b, g1c, b1c, w2t, g2c, b2c)

    # TODO(synk): in a full U-Net, keep the padded lane-dense (Cout, Sp_pad)
    # layout as the inter-layer contract (the next conv wants the halo anyway)
    # instead of paying this XLA strip pass.
    out = out_flat[:, :, :Sp].reshape(N, cout, Hp, Wp)[:, :, 1:H + 1, 1:W + 1]
    return out


def up_forward_ref(x1, x2, params):
    """Pure-JAX reference matching the PyTorch module semantics."""
    w1, g1, b1, w2, g2, b2 = params

    def conv3x3(x, w):
        return jax.lax.conv_general_dilated(
            x, w, window_strides=(1, 1), padding=((1, 1), (1, 1)),
            dimension_numbers=("NCHW", "OIHW", "NCHW"))

    def inorm_relu(x, g, b):
        mean = jnp.mean(x, axis=(2, 3), keepdims=True)
        var = jnp.mean((x - mean) ** 2, axis=(2, 3), keepdims=True)
        y = (x - mean) / jnp.sqrt(var + EPS)
        y = y * g.reshape(1, -1, 1, 1) + b.reshape(1, -1, 1, 1)
        return jnp.maximum(y, 0.0)

    x1u = jnp.repeat(jnp.repeat(x1, 2, axis=2), 2, axis=3)
    diffX = x1u.shape[2] - x2.shape[2]
    diffY = x1u.shape[3] - x2.shape[3]
    x2p = jnp.pad(x2, ((0, 0), (0, 0),
                       (diffX // 2, int(diffX / 2)),
                       (diffY // 2, int(diffY / 2))))
    x = jnp.concatenate([x2p, x1u], axis=1)
    x = inorm_relu(conv3x3(x, w1), g1, b1)
    x = inorm_relu(conv3x3(x, w2), g2, b2)
    return x


if __name__ == "__main__":
    key = jax.random.PRNGKey(0)
    in_ch, out_ch = 8, 4          # Up(in_ch=8, out_ch=4, bilinear=True)
    N, Hs, Ws = 2, 8, 8           # x1 spatial (pre-upsample); x2 is (2*Hs, 2*Ws)
    c1 = in_ch // 2               # channels of x1 (deep path)
    c2 = in_ch - c1               # channels of x2 (skip path); c1 + c2 == in_ch

    keys = jax.random.split(key, 8)
    x1 = jax.random.normal(keys[0], (N, c1, Hs, Ws), jnp.float32)
    x2 = jax.random.normal(keys[1], (N, c2, 2 * Hs, 2 * Ws), jnp.float32)

    # DoubleConv params in PyTorch layout: conv weights (Cout, Cin, 3, 3), no bias.
    w1 = 0.1 * jax.random.normal(keys[2], (out_ch, in_ch, 3, 3), jnp.float32)
    g1 = 1.0 + 0.1 * jax.random.normal(keys[3], (out_ch,), jnp.float32)
    b1 = 0.1 * jax.random.normal(keys[4], (out_ch,), jnp.float32)
    w2 = 0.1 * jax.random.normal(keys[5], (out_ch, out_ch, 3, 3), jnp.float32)
    g2 = 1.0 + 0.1 * jax.random.normal(keys[6], (out_ch,), jnp.float32)
    b2 = 0.1 * jax.random.normal(keys[7], (out_ch,), jnp.float32)
    params = (w1, g1, b1, w2, g2, b2)

    ref = jax.block_until_ready(up_forward_ref(x1, x2, params))

    # f32 matmul operands: tight check against the f32 reference.
    out_f32 = jax.block_until_ready(
        up_forward(x1, x2, params, compute_dtype=jnp.float32))
    assert out_f32.shape == (N, out_ch, 2 * Hs, 2 * Ws), out_f32.shape
    np.testing.assert_allclose(np.asarray(out_f32), np.asarray(ref),
                               rtol=2e-3, atol=2e-3)

    # Default path (bf16 matmul operands, f32 accumulation/norm): loose check.
    out_bf16 = jax.block_until_ready(up_forward(x1, x2, params))
    np.testing.assert_allclose(np.asarray(out_bf16), np.asarray(ref),
                               rtol=6e-2, atol=6e-2)

    print("KERNEL_OK")
</pallas_src>

<mosaic_0001>
module attributes {stable_mosaic.version = 11 : i64} {
  func.func @_double_conv_kernel(%arg0: i32, %arg1: memref<1x4x384xf32, #tpu.memory_space<vmem>>, %arg2: memref<1x4x384xf32, #tpu.memory_space<vmem>>, %arg3: memref<1x384xf32, #tpu.memory_space<vmem>>, %arg4: memref<9x4x4xf32, #tpu.memory_space<vmem>>, %arg5: memref<9x4x4xf32, #tpu.memory_space<vmem>>, %arg6: memref<4x1xf32, #tpu.memory_space<vmem>>, %arg7: memref<4x1xf32, #tpu.memory_space<vmem>>, %arg8: memref<9x4x4xf32, #tpu.memory_space<vmem>>, %arg9: memref<4x1xf32, #tpu.memory_space<vmem>>, %arg10: memref<4x1xf32, #tpu.memory_space<vmem>>, %arg11: memref<1x4x384xf32, #tpu.memory_space<vmem>>) attributes {dimension_semantics = [#tpu.dimension_semantics<parallel>], iteration_bounds = array<i64: 2>, scalar_prefetch = 0 : i64, scratch_operands = 0 : i64, tpu.core_type = #tpu.core_type<tc>, window_params = [{transform_indices = @transform_0, window_bounds = array<i64: 1, 4, 384>}, {transform_indices = @transform_1, window_bounds = array<i64: 1, 4, 384>}, {pipeline_mode = #tpu.pipeline_mode<synchronous>, transform_indices = @transform_2, window_bounds = array<i64: 1, 384>}, {pipeline_mode = #tpu.pipeline_mode<synchronous>, transform_indices = @transform_3, window_bounds = array<i64: 9, 4, 4>}, {pipeline_mode = #tpu.pipeline_mode<synchronous>, transform_indices = @transform_4, window_bounds = array<i64: 9, 4, 4>}, {pipeline_mode = #tpu.pipeline_mode<synchronous>, transform_indices = @transform_5, window_bounds = array<i64: 4, 1>}, {pipeline_mode = #tpu.pipeline_mode<synchronous>, transform_indices = @transform_6, window_bounds = array<i64: 4, 1>}, {pipeline_mode = #tpu.pipeline_mode<synchronous>, transform_indices = @transform_7, window_bounds = array<i64: 9, 4, 4>}, {pipeline_mode = #tpu.pipeline_mode<synchronous>, transform_indices = @transform_8, window_bounds = array<i64: 4, 1>}, {pipeline_mode = #tpu.pipeline_mode<synchronous>, transform_indices = @transform_9, window_bounds = array<i64: 4, 1>}, {transform_indices = @transform_10, window_bounds = array<i64: 1, 4, 384>}]} {
    %c0 = arith.constant 0 : index
    %c0_0 = arith.constant 0 : index
    %0 = vector.load %arg3[%c0, %c0_0] : memref<1x384xf32, #tpu.memory_space<vmem>>, vector<1x384xf32>
    %c0_1 = arith.constant 0 : index
    %c0_2 = arith.constant 0 : index
    %c0_3 = arith.constant 0 : index
    %1 = vector.load %arg1[%c0_1, %c0_2, %c0_3] : memref<1x4x384xf32, #tpu.memory_space<vmem>>, vector<1x4x384xf32>
    %2 = vector.shape_cast %1 : vector<1x4x384xf32> to vector<4x384xf32>
    %c0_4 = arith.constant 0 : index
    %c0_5 = arith.constant 0 : index
    %c0_6 = arith.constant 0 : index
    %3 = vector.load %arg4[%c0_4, %c0_5, %c0_6] : memref<9x4x4xf32, #tpu.memory_space<vmem>>, vector<1x4x4xf32>
    %4 = vector.shape_cast %3 : vector<1x4x4xf32> to vector<4x4xf32>
    %c19_i32 = arith.constant 19 : i32
    %5 = tpu.dynamic_rotate %2 by %c19_i32 dim 1 : vector<4x384xf32>, i32 -> vector<4x384xf32>
    %cst = arith.constant dense<0.000000e+00> : vector<4x384xf32>
    %6 = tpu.matmul %4, %5, %cst {dimension_numbers = #tpu.dot_dimension_numbers<[1], [0], [0], [1], [0, 0, 1, 1], [], []>} : vector<4x4xf32>, vector<4x384xf32>, vector<4x384xf32> -> vector<4x384xf32>
    %c1 = arith.constant 1 : index
    %c0_7 = arith.constant 0 : index
    %c0_8 = arith.constant 0 : index
    %7 = vector.load %arg4[%c1, %c0_7, %c0_8] : memref<9x4x4xf32, #tpu.memory_space<vmem>>, vector<1x4x4xf32>
    %8 = vector.shape_cast %7 : vector<1x4x4xf32> to vector<4x4xf32>
    %c18_i32 = arith.constant 18 : i32
    %9 = tpu.dynamic_rotate %2 by %c18_i32 dim 1 : vector<4x384xf32>, i32 -> vector<4x384xf32>
    %cst_9 = arith.constant dense<0.000000e+00> : vector<4x384xf32>
    %10 = tpu.matmul %8, %9, %cst_9 {dimension_numbers = #tpu.dot_dimension_numbers<[1], [0], [0], [1], [0, 0, 1, 1], [], []>} : vector<4x4xf32>, vector<4x384xf32>, vector<4x384xf32> -> vector<4x384xf32>
    %11 = arith.addf %6, %10 : vector<4x384xf32>
    %c2 = arith.constant 2 : index
    %c0_10 = arith.constant 0 : index
    %c0_11 = arith.constant 0 : index
    %12 = vector.load %arg4[%c2, %c0_10, %c0_11] : memref<9x4x4xf32, #tpu.memory_space<vmem>>, vector<1x4x4xf32>
    %13 = vector.shape_cast %12 : vector<1x4x4xf32> to vector<4x4xf32>
    %c17_i32 = arith.constant 17 : i32
    %14 = tpu.dynamic_rotate %2 by %c17_i32 dim 1 : vector<4x384xf32>, i32 -> vector<4x384xf32>
    %cst_12 = arith.constant dense<0.000000e+00> : vector<4x384xf32>
    %15 = tpu.matmul %13, %14, %cst_12 {dimension_numbers = #tpu.dot_dimension_numbers<[1], [0], [0], [1], [0, 0, 1, 1], [], []>} : vector<4x4xf32>, vector<4x384xf32>, vector<4x384xf32> -> vector<4x384xf32>
    %16 = arith.addf %11, %15 : vector<4x384xf32>
    %c3 = arith.constant 3 : index
    %c0_13 = arith.constant 0 : index
    %c0_14 = arith.constant 0 : index
    %17 = vector.load %arg4[%c3, %c0_13, %c0_14] : memref<9x4x4xf32, #tpu.memory_space<vmem>>, vector<1x4x4xf32>
    %18 = vector.shape_cast %17 : vector<1x4x4xf32> to vector<4x4xf32>
    %c1_i32 = arith.constant 1 : i32
    %19 = tpu.dynamic_rotate %2 by %c1_i32 dim 1 : vector<4x384xf32>, i32 -> vector<4x384xf32>
    %cst_15 = arith.constant dense<0.000000e+00> : vector<4x384xf32>
    %20 = tpu.matmul %18, %19, %cst_15 {dimension_numbers = #tpu.dot_dimension_numbers<[1], [0], [0], [1], [0, 0, 1, 1], [], []>} : vector<4x4xf32>, vector<4x384xf32>, vector<4x384xf32> -> vector<4x384xf32>
    %21 = arith.addf %16, %20 : vector<4x384xf32>
    %c4 = arith.constant 4 : index
    %c0_16 = arith.constant 0 : index
    %c0_17 = arith.constant 0 : index
    %22 = vector.load %arg4[%c4, %c0_16, %c0_17] : memref<9x4x4xf32, #tpu.memory_space<vmem>>, vector<1x4x4xf32>
    %23 = vector.shape_cast %22 : vector<1x4x4xf32> to vector<4x4xf32>
    %cst_18 = arith.constant dense<0.000000e+00> : vector<4x384xf32>
    %24 = tpu.matmul %23, %2, %cst_18 {dimension_numbers = #tpu.dot_dimension_numbers<[1], [0], [0], [1], [0, 0, 1, 1], [], []>} : vector<4x4xf32>, vector<4x384xf32>, vector<4x384xf32> -> vector<4x384xf32>
    %25 = arith.addf %21, %24 : vector<4x384xf32>
    %c5 = arith.constant 5 : index
    %c0_19 = arith.constant 0 : index
    %c0_20 = arith.constant 0 : index
    %26 = vector.load %arg4[%c5, %c0_19, %c0_20] : memref<9x4x4xf32, #tpu.memory_space<vmem>>, vector<1x4x4xf32>
    %27 = vector.shape_cast %26 : vector<1x4x4xf32> to vector<4x4xf32>
    %c383_i32 = arith.constant 383 : i32
    %28 = tpu.dynamic_rotate %2 by %c383_i32 dim 1 : vector<4x384xf32>, i32 -> vector<4x384xf32>
    %cst_21 = arith.constant dense<0.000000e+00> : vector<4x384xf32>
    %29 = tpu.matmul %27, %28, %cst_21 {dimension_numbers = #tpu.dot_dimension_numbers<[1], [0], [0], [1], [0, 0, 1, 1], [], []>} : vector<4x4xf32>, vector<4x384xf32>, vector<4x384xf32> -> vector<4x384xf32>
    %30 = arith.addf %25, %29 : vector<4x384xf32>
    %c6 = arith.constant 6 : index
    %c0_22 = arith.constant 0 : index
    %c0_23 = arith.constant 0 : index
    %31 = vector.load %arg4[%c6, %c0_22, %c0_23] : memref<9x4x4xf32, #tpu.memory_space<vmem>>, vector<1x4x4xf32>
    %32 = vector.shape_cast %31 : vector<1x4x4xf32> to vector<4x4xf32>
    %c367_i32 = arith.constant 367 : i32
    %33 = tpu.dynamic_rotate %2 by %c367_i32 dim 1 : vector<4x384xf32>, i32 -> vector<4x384xf32>
    %cst_24 = arith.constant dense<0.000000e+00> : vector<4x384xf32>
    %34 = tpu.matmul %32, %33, %cst_24 {dimension_numbers = #tpu.dot_dimension_numbers<[1], [0], [0], [1], [0, 0, 1, 1], [], []>} : vector<4x4xf32>, vector<4x384xf32>, vector<4x384xf32> -> vector<4x384xf32>
    %35 = arith.addf %30, %34 : vector<4x384xf32>
    %c7 = arith.constant 7 : index
    %c0_25 = arith.constant 0 : index
    %c0_26 = arith.constant 0 : index
    %36 = vector.load %arg4[%c7, %c0_25, %c0_26] : memref<9x4x4xf32, #tpu.memory_space<vmem>>, vector<1x4x4xf32>
    %37 = vector.shape_cast %36 : vector<1x4x4xf32> to vector<4x4xf32>
    %c366_i32 = arith.constant 366 : i32
    %38 = tpu.dynamic_rotate %2 by %c366_i32 dim 1 : vector<4x384xf32>, i32 -> vector<4x384xf32>
    %cst_27 = arith.constant dense<0.000000e+00> : vector<4x384xf32>
    %39 = tpu.matmul %37, %38, %cst_27 {dimension_numbers = #tpu.dot_dimension_numbers<[1], [0], [0], [1], [0, 0, 1, 1], [], []>} : vector<4x4xf32>, vector<4x384xf32>, vector<4x384xf32> -> vector<4x384xf32>
    %40 = arith.addf %35, %39 : vector<4x384xf32>
    %c8 = arith.constant 8 : index
    %c0_28 = arith.constant 0 : index
    %c0_29 = arith.constant 0 : index
    %41 = vector.load %arg4[%c8, %c0_28, %c0_29] : memref<9x4x4xf32, #tpu.memory_space<vmem>>, vector<1x4x4xf32>
    %42 = vector.shape_cast %41 : vector<1x4x4xf32> to vector<4x4xf32>
    %c365_i32 = arith.constant 365 : i32
    %43 = tpu.dynamic_rotate %2 by %c365_i32 dim 1 : vector<4x384xf32>, i32 -> vector<4x384xf32>
    %cst_30 = arith.constant dense<0.000000e+00> : vector<4x384xf32>
    %44 = tpu.matmul %42, %43, %cst_30 {dimension_numbers = #tpu.dot_dimension_numbers<[1], [0], [0], [1], [0, 0, 1, 1], [], []>} : vector<4x4xf32>, vector<4x384xf32>, vector<4x384xf32> -> vector<4x384xf32>
    %45 = arith.addf %40, %44 : vector<4x384xf32>
    %c0_31 = arith.constant 0 : index
    %c0_32 = arith.constant 0 : index
    %c0_33 = arith.constant 0 : index
    %46 = vector.load %arg2[%c0_31, %c0_32, %c0_33] : memref<1x4x384xf32, #tpu.memory_space<vmem>>, vector<1x4x384xf32>
    %47 = vector.shape_cast %46 : vector<1x4x384xf32> to vector<4x384xf32>
    %c0_34 = arith.constant 0 : index
    %c0_35 = arith.constant 0 : index
    %c0_36 = arith.constant 0 : index
    %48 = vector.load %arg5[%c0_34, %c0_35, %c0_36] : memref<9x4x4xf32, #tpu.memory_space<vmem>>, vector<1x4x4xf32>
    %49 = vector.shape_cast %48 : vector<1x4x4xf32> to vector<4x4xf32>
    %c19_i32_37 = arith.constant 19 : i32
    %50 = tpu.dynamic_rotate %47 by %c19_i32_37 dim 1 : vector<4x384xf32>, i32 -> vector<4x384xf32>
    %cst_38 = arith.constant dense<0.000000e+00> : vector<4x384xf32>
    %51 = tpu.matmul %49, %50, %cst_38 {dimension_numbers = #tpu.dot_dimension_numbers<[1], [0], [0], [1], [0, 0, 1, 1], [], []>} : vector<4x4xf32>, vector<4x384xf32>, vector<4x384xf32> -> vector<4x384xf32>
    %c1_39 = arith.constant 1 : index
    %c0_40 = arith.constant 0 : index
    %c0_41 = arith.constant 0 : index
    %52 = vector.load %arg5[%c1_39, %c0_40, %c0_41] : memref<9x4x4xf32, #tpu.memory_space<vmem>>, vector<1x4x4xf32>
    %53 = vector.shape_cast %52 : vector<1x4x4xf32> to vector<4x4xf32>
    %c18_i32_42 = arith.constant 18 : i32
    %54 = tpu.dynamic_rotate %47 by %c18_i32_42 dim 1 : vector<4x384xf32>, i32 -> vector<4x384xf32>
    %cst_43 = arith.constant dense<0.000000e+00> : vector<4x384xf32>
    %55 = tpu.matmul %53, %54, %cst_43 {dimension_numbers = #tpu.dot_dimension_numbers<[1], [0], [0], [1], [0, 0, 1, 1], [], []>} : vector<4x4xf32>, vector<4x384xf32>, vector<4x384xf32> -> vector<4x384xf32>
    %56 = arith.addf %51, %55 : vector<4x384xf32>
    %c2_44 = arith.constant 2 : index
    %c0_45 = arith.constant 0 : index
    %c0_46 = arith.constant 0 : index
    %57 = vector.load %arg5[%c2_44, %c0_45, %c0_46] : memref<9x4x4xf32, #tpu.memory_space<vmem>>, vector<1x4x4xf32>
    %58 = vector.shape_cast %57 : vector<1x4x4xf32> to vector<4x4xf32>
    %c17_i32_47 = arith.constant 17 : i32
    %59 = tpu.dynamic_rotate %47 by %c17_i32_47 dim 1 : vector<4x384xf32>, i32 -> vector<4x384xf32>
    %cst_48 = arith.constant dense<0.000000e+00> : vector<4x384xf32>
    %60 = tpu.matmul %58, %59, %cst_48 {dimension_numbers = #tpu.dot_dimension_numbers<[1], [0], [0], [1], [0, 0, 1, 1], [], []>} : vector<4x4xf32>, vector<4x384xf32>, vector<4x384xf32> -> vector<4x384xf32>
    %61 = arith.addf %56, %60 : vector<4x384xf32>
    %c3_49 = arith.constant 3 : index
    %c0_50 = arith.constant 0 : index
    %c0_51 = arith.constant 0 : index
    %62 = vector.load %arg5[%c3_49, %c0_50, %c0_51] : memref<9x4x4xf32, #tpu.memory_space<vmem>>, vector<1x4x4xf32>
    %63 = vector.shape_cast %62 : vector<1x4x4xf32> to vector<4x4xf32>
    %c1_i32_52 = arith.constant 1 : i32
    %64 = tpu.dynamic_rotate %47 by %c1_i32_52 dim 1 : vector<4x384xf32>, i32 -> vector<4x384xf32>
    %cst_53 = arith.constant dense<0.000000e+00> : vector<4x384xf32>
    %65 = tpu.matmul %63, %64, %cst_53 {dimension_numbers = #tpu.dot_dimension_numbers<[1], [0], [0], [1], [0, 0, 1, 1], [], []>} : vector<4x4xf32>, vector<4x384xf32>, vector<4x384xf32> -> vector<4x384xf32>
    %66 = arith.addf %61, %65 : vector<4x384xf32>
    %c4_54 = arith.constant 4 : index
    %c0_55 = arith.constant 0 : index
    %c0_56 = arith.constant 0 : index
    %67 = vector.load %arg5[%c4_54, %c0_55, %c0_56] : memref<9x4x4xf32, #tpu.memory_space<vmem>>, vector<1x4x4xf32>
    %68 = vector.shape_cast %67 : vector<1x4x4xf32> to vector<4x4xf32>
    %cst_57 = arith.constant dense<0.000000e+00> : vector<4x384xf32>
    %69 = tpu.matmul %68, %47, %cst_57 {dimension_numbers = #tpu.dot_dimension_numbers<[1], [0], [0], [1], [0, 0, 1, 1], [], []>} : vector<4x4xf32>, vector<4x384xf32>, vector<4x384xf32> -> vector<4x384xf32>
    %70 = arith.addf %66, %69 : vector<4x384xf32>
    %c5_58 = arith.constant 5 : index
    %c0_59 = arith.constant 0 : index
    %c0_60 = arith.constant 0 : index
    %71 = vector.load %arg5[%c5_58, %c0_59, %c0_60] : memref<9x4x4xf32, #tpu.memory_space<vmem>>, vector<1x4x4xf32>
    %72 = vector.shape_cast %71 : vector<1x4x4xf32> to vector<4x4xf32>
    %c383_i32_61 = arith.constant 383 : i32
    %73 = tpu.dynamic_rotate %47 by %c383_i32_61 dim 1 : vector<4x384xf32>, i32 -> vector<4x384xf32>
    %cst_62 = arith.constant dense<0.000000e+00> : vector<4x384xf32>
    %74 = tpu.matmul %72, %73, %cst_62 {dimension_numbers = #tpu.dot_dimension_numbers<[1], [0], [0], [1], [0, 0, 1, 1], [], []>} : vector<4x4xf32>, vector<4x384xf32>, vector<4x384xf32> -> vector<4x384xf32>
    %75 = arith.addf %70, %74 : vector<4x384xf32>
    %c6_63 = arith.constant 6 : index
    %c0_64 = arith.constant 0 : index
    %c0_65 = arith.constant 0 : index
    %76 = vector.load %arg5[%c6_63, %c0_64, %c0_65] : memref<9x4x4xf32, #tpu.memory_space<vmem>>, vector<1x4x4xf32>
    %77 = vector.shape_cast %76 : vector<1x4x4xf32> to vector<4x4xf32>
    %c367_i32_66 = arith.constant 367 : i32
    %78 = tpu.dynamic_rotate %47 by %c367_i32_66 dim 1 : vector<4x384xf32>, i32 -> vector<4x384xf32>
    %cst_67 = arith.constant dense<0.000000e+00> : vector<4x384xf32>
    %79 = tpu.matmul %77, %78, %cst_67 {dimension_numbers = #tpu.dot_dimension_numbers<[1], [0], [0], [1], [0, 0, 1, 1], [], []>} : vector<4x4xf32>, vector<4x384xf32>, vector<4x384xf32> -> vector<4x384xf32>
    %80 = arith.addf %75, %79 : vector<4x384xf32>
    %c7_68 = arith.constant 7 : index
    %c0_69 = arith.constant 0 : index
    %c0_70 = arith.constant 0 : index
    %81 = vector.load %arg5[%c7_68, %c0_69, %c0_70] : memref<9x4x4xf32, #tpu.memory_space<vmem>>, vector<1x4x4xf32>
    %82 = vector.shape_cast %81 : vector<1x4x4xf32> to vector<4x4xf32>
    %c366_i32_71 = arith.constant 366 : i32
    %83 = tpu.dynamic_rotate %47 by %c366_i32_71 dim 1 : vector<4x384xf32>, i32 -> vector<4x384xf32>
    %cst_72 = arith.constant dense<0.000000e+00> : vector<4x384xf32>
    %84 = tpu.matmul %82, %83, %cst_72 {dimension_numbers = #tpu.dot_dimension_numbers<[1], [0], [0], [1], [0, 0, 1, 1], [], []>} : vector<4x4xf32>, vector<4x384xf32>, vector<4x384xf32> -> vector<4x384xf32>
    %85 = arith.addf %80, %84 : vector<4x384xf32>
    %c8_73 = arith.constant 8 : index
    %c0_74 = arith.constant 0 : index
    %c0_75 = arith.constant 0 : index
    %86 = vector.load %arg5[%c8_73, %c0_74, %c0_75] : memref<9x4x4xf32, #tpu.memory_space<vmem>>, vector<1x4x4xf32>
    %87 = vector.shape_cast %86 : vector<1x4x4xf32> to vector<4x4xf32>
    %c365_i32_76 = arith.constant 365 : i32
    %88 = tpu.dynamic_rotate %47 by %c365_i32_76 dim 1 : vector<4x384xf32>, i32 -> vector<4x384xf32>
    %cst_77 = arith.constant dense<0.000000e+00> : vector<4x384xf32>
    %89 = tpu.matmul %87, %88, %cst_77 {dimension_numbers = #tpu.dot_dimension_numbers<[1], [0], [0], [1], [0, 0, 1, 1], [], []>} : vector<4x4xf32>, vector<4x384xf32>, vector<4x384xf32> -> vector<4x384xf32>
    %90 = arith.addf %85, %89 : vector<4x384xf32>
    %91 = arith.addf %45, %90 : vector<4x384xf32>
    %c0_78 = arith.constant 0 : index
    %c0_79 = arith.constant 0 : index
    %92 = vector.load %arg6[%c0_78, %c0_79] : memref<4x1xf32, #tpu.memory_space<vmem>>, vector<4x1xf32>
    %c0_80 = arith.constant 0 : index
    %c0_81 = arith.constant 0 : index
    %93 = vector.load %arg7[%c0_80, %c0_81] : memref<4x1xf32, #tpu.memory_space<vmem>>, vector<4x1xf32>
    %94 = vector.broadcast %0 : vector<1x384xf32> to vector<4x384xf32>
    %95 = arith.mulf %91, %94 : vector<4x384xf32>
    %cst_82 = arith.constant dense<0.000000e+00> : vector<4xf32>
    %96 = vector.multi_reduction <add>, %95, %cst_82 [1] : vector<4x384xf32> to vector<4xf32>
    %97 = vector.shape_cast %96 : vector<4xf32> to vector<4x1xf32>
    %cst_83 = arith.constant 3.906250e-03 : f32
    %98 = vector.broadcast %cst_83 : f32 to vector<4x1xf32>
    %99 = arith.mulf %97, %98 : vector<4x1xf32>
    %100 = arith.mulf %95, %91 : vector<4x384xf32>
    %cst_84 = arith.constant dense<0.000000e+00> : vector<4xf32>
    %101 = vector.multi_reduction <add>, %100, %cst_84 [1] : vector<4x384xf32> to vector<4xf32>
    %102 = vector.shape_cast %101 : vector<4xf32> to vector<4x1xf32>
    %cst_85 = arith.constant 3.906250e-03 : f32
    %103 = vector.broadcast %cst_85 : f32 to vector<4x1xf32>
    %104 = arith.mulf %102, %103 : vector<4x1xf32>
    %105 = arith.mulf %99, %99 : vector<4x1xf32>
    %106 = arith.subf %104, %105 : vector<4x1xf32>
    %cst_86 = arith.constant 9.99999974E-6 : f32
    %107 = vector.broadcast %cst_86 : f32 to vector<4x1xf32>
    %108 = arith.addf %106, %107 : vector<4x1xf32>
    %109 = math.rsqrt %108 : vector<4x1xf32>
    %110 = arith.mulf %92, %109 : vector<4x1xf32>
    %111 = arith.mulf %99, %110 : vector<4x1xf32>
    %112 = arith.subf %93, %111 : vector<4x1xf32>
    %113 = vector.broadcast %110 : vector<4x1xf32> to vector<4x384xf32>
    %114 = arith.mulf %91, %113 : vector<4x384xf32>
    %115 = vector.broadcast %112 : vector<4x1xf32> to vector<4x384xf32>
    %116 = arith.addf %114, %115 : vector<4x384xf32>
    %cst_87 = arith.constant 0.000000e+00 : f32
    %117 = vector.broadcast %cst_87 : f32 to vector<4x384xf32>
    %118 = arith.maximumf %116, %117 : vector<4x384xf32>
    %119 = vector.broadcast %0 : vector<1x384xf32> to vector<4x384xf32>
    %120 = arith.mulf %118, %119 : vector<4x384xf32>
    %c0_88 = arith.constant 0 : index
    %c0_89 = arith.constant 0 : index
    %c0_90 = arith.constant 0 : index
    %121 = vector.load %arg8[%c0_88, %c0_89, %c0_90] : memref<9x4x4xf32, #tpu.memory_space<vmem>>, vector<1x4x4xf32>
    %122 = vector.shape_cast %121 : vector<1x4x4xf32> to vector<4x4xf32>
    %c19_i32_91 = arith.constant 19 : i32
    %123 = tpu.dynamic_rotate %120 by %c19_i32_91 dim 1 : vector<4x384xf32>, i32 -> vector<4x384xf32>
    %cst_92 = arith.constant dense<0.000000e+00> : vector<4x384xf32>
    %124 = tpu.matmul %122, %123, %cst_92 {dimension_numbers = #tpu.dot_dimension_numbers<[1], [0], [0], [1], [0, 0, 1, 1], [], []>} : vector<4x4xf32>, vector<4x384xf32>, vector<4x384xf32> -> vector<4x384xf32>
    %c1_93 = arith.constant 1 : index
    %c0_94 = arith.constant 0 : index
    %c0_95 = arith.constant 0 : index
    %125 = vector.load %arg8[%c1_93, %c0_94, %c0_95] : memref<9x4x4xf32, #tpu.memory_space<vmem>>, vector<1x4x4xf32>
    %126 = vector.shape_cast %125 : vector<1x4x4xf32> to vector<4x4xf32>
    %c18_i32_96 = arith.constant 18 : i32
    %127 = tpu.dynamic_rotate %120 by %c18_i32_96 dim 1 : vector<4x384xf32>, i32 -> vector<4x384xf32>
    %cst_97 = arith.constant dense<0.000000e+00> : vector<4x384xf32>
    %128 = tpu.matmul %126, %127, %cst_97 {dimension_numbers = #tpu.dot_dimension_numbers<[1], [0], [0], [1], [0, 0, 1, 1], [], []>} : vector<4x4xf32>, vector<4x384xf32>, vector<4x384xf32> -> vector<4x384xf32>
    %129 = arith.addf %124, %128 : vector<4x384xf32>
    %c2_98 = arith.constant 2 : index
    %c0_99 = arith.constant 0 : index
    %c0_100 = arith.constant 0 : index
    %130 = vector.load %arg8[%c2_98, %c0_99, %c0_100] : memref<9x4x4xf32, #tpu.memory_space<vmem>>, vector<1x4x4xf32>
    %131 = vector.shape_cast %130 : vector<1x4x4xf32> to vector<4x4xf32>
    %c17_i32_101 = arith.constant 17 : i32
    %132 = tpu.dynamic_rotate %120 by %c17_i32_101 dim 1 : vector<4x384xf32>, i32 -> vector<4x384xf32>
    %cst_102 = arith.constant dense<0.000000e+00> : vector<4x384xf32>
    %133 = tpu.matmul %131, %132, %cst_102 {dimension_numbers = #tpu.dot_dimension_numbers<[1], [0], [0], [1], [0, 0, 1, 1], [], []>} : vector<4x4xf32>, vector<4x384xf32>, vector<4x384xf32> -> vector<4x384xf32>
    %134 = arith.addf %129, %133 : vector<4x384xf32>
    %c3_103 = arith.constant 3 : index
    %c0_104 = arith.constant 0 : index
    %c0_105 = arith.constant 0 : index
    %135 = vector.load %arg8[%c3_103, %c0_104, %c0_105] : memref<9x4x4xf32, #tpu.memory_space<vmem>>, vector<1x4x4xf32>
    %136 = vector.shape_cast %135 : vector<1x4x4xf32> to vector<4x4xf32>
    %c1_i32_106 = arith.constant 1 : i32
    %137 = tpu.dynamic_rotate %120 by %c1_i32_106 dim 1 : vector<4x384xf32>, i32 -> vector<4x384xf32>
    %cst_107 = arith.constant dense<0.000000e+00> : vector<4x384xf32>
    %138 = tpu.matmul %136, %137, %cst_107 {dimension_numbers = #tpu.dot_dimension_numbers<[1], [0], [0], [1], [0, 0, 1, 1], [], []>} : vector<4x4xf32>, vector<4x384xf32>, vector<4x384xf32> -> vector<4x384xf32>
    %139 = arith.addf %134, %138 : vector<4x384xf32>
    %c4_108 = arith.constant 4 : index
    %c0_109 = arith.constant 0 : index
    %c0_110 = arith.constant 0 : index
    %140 = vector.load %arg8[%c4_108, %c0_109, %c0_110] : memref<9x4x4xf32, #tpu.memory_space<vmem>>, vector<1x4x4xf32>
    %141 = vector.shape_cast %140 : vector<1x4x4xf32> to vector<4x4xf32>
    %cst_111 = arith.constant dense<0.000000e+00> : vector<4x384xf32>
    %142 = tpu.matmul %141, %120, %cst_111 {dimension_numbers = #tpu.dot_dimension_numbers<[1], [0], [0], [1], [0, 0, 1, 1], [], []>} : vector<4x4xf32>, vector<4x384xf32>, vector<4x384xf32> -> vector<4x384xf32>
    %143 = arith.addf %139, %142 : vector<4x384xf32>
    %c5_112 = arith.constant 5 : index
    %c0_113 = arith.constant 0 : index
    %c0_114 = arith.constant 0 : index
    %144 = vector.load %arg8[%c5_112, %c0_113, %c0_114] : memref<9x4x4xf32, #tpu.memory_space<vmem>>, vector<1x4x4xf32>
    %145 = vector.shape_cast %144 : vector<1x4x4xf32> to vector<4x4xf32>
    %c383_i32_115 = arith.constant 383 : i32
    %146 = tpu.dynamic_rotate %120 by %c383_i32_115 dim 1 : vector<4x384xf32>, i32 -> vector<4x384xf32>
    %cst_116 = arith.constant dense<0.000000e+00> : vector<4x384xf32>
    %147 = tpu.matmul %145, %146, %cst_116 {dimension_numbers = #tpu.dot_dimension_numbers<[1], [0], [0], [1], [0, 0, 1, 1], [], []>} : vector<4x4xf32>, vector<4x384xf32>, vector<4x384xf32> -> vector<4x384xf32>
    %148 = arith.addf %143, %147 : vector<4x384xf32>
    %c6_117 = arith.constant 6 : index
    %c0_118 = arith.constant 0 : index
    %c0_119 = arith.constant 0 : index
    %149 = vector.load %arg8[%c6_117, %c0_118, %c0_119] : memref<9x4x4xf32, #tpu.memory_space<vmem>>, vector<1x4x4xf32>
    %150 = vector.shape_cast %149 : vector<1x4x4xf32> to vector<4x4xf32>
    %c367_i32_120 = arith.constant 367 : i32
    %151 = tpu.dynamic_rotate %120 by %c367_i32_120 dim 1 : vector<4x384xf32>, i32 -> vector<4x384xf32>
    %cst_121 = arith.constant dense<0.000000e+00> : vector<4x384xf32>
    %152 = tpu.matmul %150, %151, %cst_121 {dimension_numbers = #tpu.dot_dimension_numbers<[1], [0], [0], [1], [0, 0, 1, 1], [], []>} : vector<4x4xf32>, vector<4x384xf32>, vector<4x384xf32> -> vector<4x384xf32>
    %153 = arith.addf %148, %152 : vector<4x384xf32>
    %c7_122 = arith.constant 7 : index
    %c0_123 = arith.constant 0 : index
    %c0_124 = arith.constant 0 : index
    %154 = vector.load %arg8[%c7_122, %c0_123, %c0_124] : memref<9x4x4xf32, #tpu.memory_space<vmem>>, vector<1x4x4xf32>
    %155 = vector.shape_cast %154 : vector<1x4x4xf32> to vector<4x4xf32>
    %c366_i32_125 = arith.constant 366 : i32
    %156 = tpu.dynamic_rotate %120 by %c366_i32_125 dim 1 : vector<4x384xf32>, i32 -> vector<4x384xf32>
    %cst_126 = arith.constant dense<0.000000e+00> : vector<4x384xf32>
    %157 = tpu.matmul %155, %156, %cst_126 {dimension_numbers = #tpu.dot_dimension_numbers<[1], [0], [0], [1], [0, 0, 1, 1], [], []>} : vector<4x4xf32>, vector<4x384xf32>, vector<4x384xf32> -> vector<4x384xf32>
    %158 = arith.addf %153, %157 : vector<4x384xf32>
    %c8_127 = arith.constant 8 : index
    %c0_128 = arith.constant 0 : index
    %c0_129 = arith.constant 0 : index
    %159 = vector.load %arg8[%c8_127, %c0_128, %c0_129] : memref<9x4x4xf32, #tpu.memory_space<vmem>>, vector<1x4x4xf32>
    %160 = vector.shape_cast %159 : vector<1x4x4xf32> to vector<4x4xf32>
    %c365_i32_130 = arith.constant 365 : i32
    %161 = tpu.dynamic_rotate %120 by %c365_i32_130 dim 1 : vector<4x384xf32>, i32 -> vector<4x384xf32>
    %cst_131 = arith.constant dense<0.000000e+00> : vector<4x384xf32>
    %162 = tpu.matmul %160, %161, %cst_131 {dimension_numbers = #tpu.dot_dimension_numbers<[1], [0], [0], [1], [0, 0, 1, 1], [], []>} : vector<4x4xf32>, vector<4x384xf32>, vector<4x384xf32> -> vector<4x384xf32>
    %163 = arith.addf %158, %162 : vector<4x384xf32>
    %c0_132 = arith.constant 0 : index
    %c0_133 = arith.constant 0 : index
    %164 = vector.load %arg9[%c0_132, %c0_133] : memref<4x1xf32, #tpu.memory_space<vmem>>, vector<4x1xf32>
    %c0_134 = arith.constant 0 : index
    %c0_135 = arith.constant 0 : index
    %165 = vector.load %arg10[%c0_134, %c0_135] : memref<4x1xf32, #tpu.memory_space<vmem>>, vector<4x1xf32>
    %166 = vector.broadcast %0 : vector<1x384xf32> to vector<4x384xf32>
    %167 = arith.mulf %163, %166 : vector<4x384xf32>
    %cst_136 = arith.constant dense<0.000000e+00> : vector<4xf32>
    %168 = vector.multi_reduction <add>, %167, %cst_136 [1] : vector<4x384xf32> to vector<4xf32>
    %169 = vector.shape_cast %168 : vector<4xf32> to vector<4x1xf32>
    %cst_137 = arith.constant 3.906250e-03 : f32
    %170 = vector.broadcast %cst_137 : f32 to vector<4x1xf32>
    %171 = arith.mulf %169, %170 : vector<4x1xf32>
    %172 = arith.mulf %167, %163 : vector<4x384xf32>
    %cst_138 = arith.constant dense<0.000000e+00> : vector<4xf32>
    %173 = vector.multi_reduction <add>, %172, %cst_138 [1] : vector<4x384xf32> to vector<4xf32>
    %174 = vector.shape_cast %173 : vector<4xf32> to vector<4x1xf32>
    %cst_139 = arith.constant 3.906250e-03 : f32
    %175 = vector.broadcast %cst_139 : f32 to vector<4x1xf32>
    %176 = arith.mulf %174, %175 : vector<4x1xf32>
    %177 = arith.mulf %171, %171 : vector<4x1xf32>
    %178 = arith.subf %176, %177 : vector<4x1xf32>
    %cst_140 = arith.constant 9.99999974E-6 : f32
    %179 = vector.broadcast %cst_140 : f32 to vector<4x1xf32>
    %180 = arith.addf %178, %179 : vector<4x1xf32>
    %181 = math.rsqrt %180 : vector<4x1xf32>
    %182 = arith.mulf %164, %181 : vector<4x1xf32>
    %183 = arith.mulf %171, %182 : vector<4x1xf32>
    %184 = arith.subf %165, %183 : vector<4x1xf32>
    %185 = vector.broadcast %182 : vector<4x1xf32> to vector<4x384xf32>
    %186 = arith.mulf %163, %185 : vector<4x384xf32>
    %187 = vector.broadcast %184 : vector<4x1xf32> to vector<4x384xf32>
    %188 = arith.addf %186, %187 : vector<4x384xf32>
    %cst_141 = arith.constant 0.000000e+00 : f32
    %189 = vector.broadcast %cst_141 : f32 to vector<4x384xf32>
    %190 = arith.maximumf %188, %189 : vector<4x384xf32>
    %191 = vector.broadcast %0 : vector<1x384xf32> to vector<4x384xf32>
    %192 = arith.mulf %190, %191 : vector<4x384xf32>
    %c0_142 = arith.constant 0 : index
    %c0_143 = arith.constant 0 : index
    %c0_144 = arith.constant 0 : index
    %193 = vector.load %arg11[%c0_142, %c0_143, %c0_144] : memref<1x4x384xf32, #tpu.memory_space<vmem>>, vector<1x4x384xf32>
    %194 = vector.shape_cast %193 : vector<1x4x384xf32> to vector<4x384xf32>
    %195 = vector.shape_cast %192 : vector<4x384xf32> to vector<1x4x384xf32>
    tpu.vector_store %arg11[%c0_142, %c0_143, %c0_144], %195 {strides = array<i32>} : memref<1x4x384xf32, #tpu.memory_space<vmem>>, vector<1x4x384xf32>,
    return
  }
  func.func @transform_0(%arg0: i32) -> (i32, i32, i32) {
    %c0_i32 = arith.constant 0 : i32
    %c0_i32_0 = arith.constant 0 : i32
    %c0_i32_1 = arith.constant 0 : i32
    return %arg0, %c0_i32, %c0_i32_0 : i32, i32, i32
  }
  func.func @transform_1(%arg0: i32) -> (i32, i32, i32) {
    %c0_i32 = arith.constant 0 : i32
    %c0_i32_0 = arith.constant 0 : i32
    %c0_i32_1 = arith.constant 0 : i32
    return %arg0, %c0_i32, %c0_i32_0 : i32, i32, i32
  }
  func.func @transform_2(%arg0: i32) -> (i32, i32) {
    %c0_i32 = arith.constant 0 : i32
    %c0_i32_0 = arith.constant 0 : i32
    %c0_i32_1 = arith.constant 0 : i32
    return %c0_i32, %c0_i32_0 : i32, i32
  }
  func.func @transform_3(%arg0: i32) -> (i32, i32, i32) {
    %c0_i32 = arith.constant 0 : i32
    %c0_i32_0 = arith.constant 0 : i32
    %c0_i32_1 = arith.constant 0 : i32
    %c0_i32_2 = arith.constant 0 : i32
    return %c0_i32, %c0_i32_0, %c0_i32_1 : i32, i32, i32
  }
  func.func @transform_4(%arg0: i32) -> (i32, i32, i32) {
    %c0_i32 = arith.constant 0 : i32
    %c0_i32_0 = arith.constant 0 : i32
    %c0_i32_1 = arith.constant 0 : i32
    %c0_i32_2 = arith.constant 0 : i32
    return %c0_i32, %c0_i32_0, %c0_i32_1 : i32, i32, i32
  }
  func.func @transform_5(%arg0: i32) -> (i32, i32) {
    %c0_i32 = arith.constant 0 : i32
    %c0_i32_0 = arith.constant 0 : i32
    %c0_i32_1 = arith.constant 0 : i32
    return %c0_i32, %c0_i32_0 : i32, i32
  }
  func.func @transform_6(%arg0: i32) -> (i32, i32) {
    %c0_i32 = arith.constant 0 : i32
    %c0_i32_0 = arith.constant 0 : i32
    %c0_i32_1 = arith.constant 0 : i32
    return %c0_i32, %c0_i32_0 : i32, i32
  }
  func.func @transform_7(%arg0: i32) -> (i32, i32, i32) {
    %c0_i32 = arith.constant 0 : i32
    %c0_i32_0 = arith.constant 0 : i32
    %c0_i32_1 = arith.constant 0 : i32
    %c0_i32_2 = arith.constant 0 : i32
    return %c0_i32, %c0_i32_0, %c0_i32_1 : i32, i32, i32
  }
  func.func @transform_8(%arg0: i32) -> (i32, i32) {
    %c0_i32 = arith.constant 0 : i32
    %c0_i32_0 = arith.constant 0 : i32
    %c0_i32_1 = arith.constant 0 : i32
    return %c0_i32, %c0_i32_0 : i32, i32
  }
  func.func @transform_9(%arg0: i32) -> (i32, i32) {
    %c0_i32 = arith.constant 0 : i32
    %c0_i32_0 = arith.constant 0 : i32
    %c0_i32_1 = arith.constant 0 : i32
    return %c0_i32, %c0_i32_0 : i32, i32
  }
  func.func @transform_10(%arg0: i32) -> (i32, i32, i32) {
    %c0_i32 = arith.constant 0 : i32
    %c0_i32_0 = arith.constant 0 : i32
    %c0_i32_1 = arith.constant 0 : i32
    return %arg0, %c0_i32, %c0_i32_0 : i32, i32, i32
  }
}

</mosaic_0001>

<bundles_post_ra>
// kernel: tpu_custom_call.1
= control target key start
LH: loop header
LB: loop body
LE: loop exit
PB: predicated region body
PF: predicated region fallthrough
CT: control target
= control target key end

     0   :  { %15 = vsyncpa [#allocation3], 0  ;;  %s6534_s0 = inlined_call_operand.vmem [shape: f32[2,4,384], index: 0, kind: input, shape index: {}]   ;;  %s6535_s1 = inlined_call_operand.vmem [shape: f32[2,4,384], index: 1, kind: input, shape index: {}]   ;;  %s6536_s2 = inlined_call_operand.vmem [shape: f32[1,384], index: 2, kind: input, shape index: {}]   ;;  %s6537_s3 = inlined_call_operand.vmem [shape: f32[9,4,4], index: 3, kind: input, shape index: {}]   ;;  %s6538_s4 = inlined_call_operand.vmem [shape: f32[9,4,4], index: 4, kind: input, shape index: {}]   ;;  %s6539_s5 = inlined_call_operand.vmem [shape: f32[4,1], index: 5, kind: input, shape index: {}]   ;;  %s6540_s6 = inlined_call_operand.vmem [shape: f32[4,1], index: 6, kind: input, shape index: {}]   ;;  %s6541_s7 = inlined_call_operand.vmem [shape: f32[9,4,4], index: 7, kind: input, shape index: {}]   ;;  %s6542_s8 = inlined_call_operand.vmem [shape: f32[4,1], index: 8, kind: input, shape index: {}]   ;;  %s6543_s9 = inlined_call_operand.vmem [shape: f32[4,1], index: 9, kind: input, shape index: {}]   ;;  %s6544_s10 = inlined_call_operand.hbm [shape: f32[2,4,384], index: 10, kind: output, shape index: {}]  }
   0x1   :  { %17 = vsyncpa [#allocation3 + $0x1], 0  ;;  %s5724_s13 = smov 0   ;;  %s5726_s14 = smov 0  }
   0x2   :  { %s5728_s15 = smov 0   ;;  %s5730_s16 = smov 0  }
   0x3 LB: > { %s5745_s17 = sadd.s32 4294967295, %s5655_s16   ;;  %s5075_s18 = sadd.s32 4294967294, %s5655_s16   ;;  %s5655_s16 = sphi %s5730_s16, %s6559_s16   ;;  %s5651_s15 = sphi %s5728_s15, %s6558_s15   ;;  %s5647_s14 = sphi %s5726_s14, %s6557_s14   ;;  %s5643_s13 = sphi %s5724_s13, %s6556_s13  }
   0x4   : > { %s5749_s19 = sadd.s32 1, %s5655_s16   ;;  %s250_s20 = sadd.s32 1, %s5651_s15 }
   0x5   : > { %s247_s21 = ssub.s32 %s5655_s16, %s5749_s19  ;;  %p260_p0 = scmp.ne.s32.totalorder %s5651_s15, %s5647_s14 }
   0x6   : > { %p248_p1 = scmp.eq.s32.totalorder %s247_s21, 0  ;;  %p261_p2 = scmp.eq.s32.totalorder %s5745_s17, 1 }
   0x7   : > { %p266_p3 = scmp.ne.s32.totalorder %s5647_s14, %s5643_s13  ;;  %p267_p4 = scmp.eq.s32.totalorder %s5075_s18, 1 }
   0x8   : > { %s5760_s22 = scalar_select %p248_p1, %s5651_s15, %s250_s20  }
   0x9   : > { %p5762_p5 = por %p261_p2, %p260_p0  ;;  %p5766_p6 = por %p267_p4, %p266_p3 }
   0xa   : > { %p5078_p7 = scmp.ge.s32.totalorder %s5655_s16, 1  ;;  %p325_p8 = scmp.lt.s32.totalorder %s5655_s16, 3 }
   0xc   : > { %p326_p9 = pnand %p5078_p7, %p325_p8 }
   0xd   : > { %p368_p10 = scmp.lt.s32.totalorder (!%p326_p9), %s5745_s17, 1  ;;  %v5657_v0 = vmov (!%p326_p9), 0.0   ;;  %vm5658_vm0 = vmmov (!%p326_p9), 0   ;;  %s5659_s30 = smov (!%p326_p9), 18   ;;  %v392_v7 = vlaneseq (!%p326_p9)  ;;  %vm414_vm2 = vcmask (!%p326_p9), 1043456  }
   0xe   : > { %329 = sbr.rel (%p326_p9) target bundleno = 1536 (0x600), region = 60  ;;  %5297 = vmatprep.subr.mxu1 (!%p326_p9), %v5657_v0  ;;  %5299 = vmatprep.mubr.msk.f32.mxu1 (!%p326_p9), %vm5658_vm0, %v5657_v0  ;;  %s5660_s11 = smov (!%p326_p9), 19   ;;  %v5081_v13 = vld [vmem:[%s6537_s3 + $0x4] sm:$0xf] (!%p326_p9)  ;;  %vm410_vm3 = vcmask (!%p326_p9), 31744  }
   0xf   : > { %488 = vmatprep.mubr.f32.mxu0 (!%p326_p9), %v5657_v0  ;;  %s5661_s12 = smov (!%p326_p9), 17   ;;  %s6547_s18 = smov (!%p326_p9), 1   ;;  %v5904_v8 = vand.u32 (!%p326_p9), 127, %v392_v7  ;;  %v381_v23 = vld [vmem:[%s6537_s3] sm:$0xf] (!%p326_p9) }
  0x10   : > { %s6545_s20 = smov (!%p326_p9), 127   ;;  %s5664_s21 = smov (!%p326_p9), 111   ;;  %v5092_v30 = vld [vmem:[%s6537_s3 + $0x8] sm:$0xf] (!%p326_p9)  ;;  %v5098_v37 = vld [vmem:[%s6537_s3 + $0xc] sm:$0xf] (!%p326_p9) }
  0x11   : > { %s5665_s27 = smov (!%p326_p9), 110   ;;  %vm406_vm1 = vcmp.lt.s32.totalorder (!%p326_p9), %v5904_v8, 18  ;;  %vm394_vm4 = vcmp.lt.s32.totalorder (!%p326_p9), %v5904_v8, 19  ;;  %vm726_vm5 = vcmp.lt.s32.totalorder (!%p326_p9), %v5904_v8, 17  ;;  %vm894_vm6 = vcmp.lt.s32.totalorder (!%p326_p9), %v5904_v8, 1 }
  0x12   : > { %vm1217_vm7 = vcmp.lt.s32.totalorder (!%p326_p9), %v5904_v8, 127  ;;  %v5104_v42 = vld [vmem:[%s6537_s3 + $0x10] sm:$0xf] (!%p326_p9)  ;;  %vm1385_vm8 = vcmp.lt.s32.totalorder (!%p326_p9), %v5904_v8, 111  ;;  %v5110_v49 = vld [vmem:[%s6537_s3 + $0x14] sm:$0xf] (!%p326_p9) }
  0x13   : > { %vm1553_vm9 = vcmp.lt.s32.totalorder (!%p326_p9), %v5904_v8, 110  ;;  %v5116_v56 = vld [vmem:[%s6537_s3 + $0x18] sm:$0xf] (!%p326_p9)  ;;  %vm1721_vm10 = vcmp.lt.s32.totalorder (!%p326_p9), %v5904_v8, 109  ;;  %v5122_v63 = vld [vmem:[%s6537_s3 + $0x1c] sm:$0xf] (!%p326_p9) }
  0x15   : > { %s5777_s25 = scalar_select %p368_p10, %s5745_s17, 1 }
  0x17   : > { %s5533_s26 = smul.u32 12, %s5777_s25  ;;  %s6553_s25 = smov 1  }
  0x19   : > { %s372_s29 = scalar_lea.vmem %s6534_s0, %s5533_s26 }
  0x1a   : > { %v5786_v1 = vld [vmem:[%s372_s29 + $0x8] sm:$0xf]  ;;  %v5788_v2 = vld [vmem:[%s372_s29] sm:$0xff] }
  0x1b   : > { %404 = vrot.lane.b32.xlu1 %v5786_v1, %s5659_s30  ;;  %400 = vrot.lane.b32.xlu0 %v5788_v2, %s5659_s30  ;;  %v5796_v3 = vcombine.high %v5788_v2, %v5788_v2 }
  0x1f   : > { %402 = vrot.lane.b32.xlu0 %v5796_v3, %s5659_s30  ;;  %386 = vrot.lane.b32.xlu1 %v5788_v2, %s5660_s11 }
  0x23   : > { %388 = vrot.lane.b32.xlu0 %v5796_v3, %s5660_s11  ;;  %390 = vrot.lane.b32.xlu1 %v5786_v1, %s5660_s11 }
  0x27   : > { %720 = vrot.lane.b32.xlu0 %v5788_v2, %s5661_s12  ;;  %722 = vrot.lane.b32.xlu1 %v5796_v3, %s5661_s12 }
  0x2b   : > { %724 = vrot.lane.b32.xlu0 %v5786_v1, %s5661_s12  ;;  %888 = vrot.lane.b32.xlu1 %v5788_v2, %s6547_s18 }
  0x2f   : > { %890 = vrot.lane.b32.xlu0 %v5796_v3, %s6547_s18  ;;  %892 = vrot.lane.b32.xlu1 %v5786_v1, %s6547_s18  ;;  %s6549_s18 = smov 109  }
  0x33   : > { %1213 = vrot.lane.b32.xlu0 %v5796_v3, %s6545_s20  ;;  %1215 = vrot.lane.b32.xlu1 %v5786_v1, %s6545_s20 }
  0x37   : > { %1211 = vrot.lane.b32.xlu0 %v5788_v2, %s6545_s20  ;;  %1381 = vrot.lane.b32.xlu1 %v5796_v3, %s5664_s21  ;;  %s377_s20 = scalar_lea.vmem %s6535_s1, %s5533_s26  ;;  %s6554_s26 = smov 127  }
  0x38   : > { %v5843_v4 = vld [vmem:[%s377_s20] sm:$0xff]  ;;  %v5857_v6 = vld [vmem:[%s377_s20 + $0x8] sm:$0xf]  ;;  %s5668_s20 = smov [#allocation2]  }
  0x39   : > { %v5851_v5 = vcombine.high %v5843_v4, %v5843_v4 }
  0x3b   : > { %1383 = vrot.lane.b32.xlu0 %v5786_v1, %s5664_s21  ;;  %1379 = vrot.lane.b32.xlu1 %v5788_v2, %s5664_s21 }
  0x3f   : > { %1549 = vrot.lane.b32.xlu0 %v5796_v3, %s5665_s27  ;;  %1551 = vrot.lane.b32.xlu1 %v5786_v1, %s5665_s27 }
  0x43   : > { %1547 = vrot.lane.b32.xlu0 %v5788_v2, %s5665_s27  ;;  %1717 = vrot.lane.b32.xlu1 %v5796_v3, %s6549_s18 }
  0x47   : > { %1719 = vrot.lane.b32.xlu0 %v5786_v1, %s6549_s18  ;;  %1715 = vrot.lane.b32.xlu1 %v5788_v2, %s6549_s18 }
  0x4b   : > { %1899 = vrot.lane.b32.xlu0 %v5843_v4, %s5659_s30  ;;  %1901 = vrot.lane.b32.xlu1 %v5851_v5, %s5659_s30 }
  0x4f   : > { %1903 = vrot.lane.b32.xlu0 %v5857_v6, %s5659_s30  ;;  %1888 = vrot.lane.b32.xlu1 %v5843_v4, %s5660_s11 }
  0x53   : > { %1890 = vrot.lane.b32.xlu0 %v5851_v5, %s5660_s11  ;;  %1892 = vrot.lane.b32.xlu1 %v5857_v6, %s5660_s11 }
  0x57   : > { %2216 = vrot.lane.b32.xlu0 %v5843_v4, %s5661_s12  ;;  %2218 = vrot.lane.b32.xlu1 %v5851_v5, %s5661_s12 }
  0x5b   : > { %2220 = vrot.lane.b32.xlu0 %v5857_v6, %s5661_s12  ;;  %2383 = vrot.lane.b32.xlu1 %v5843_v4, %s6553_s25 }
  0x5f   : > { %2385 = vrot.lane.b32.xlu0 %v5851_v5, %s6553_s25  ;;  %2387 = vrot.lane.b32.xlu1 %v5857_v6, %s6553_s25 }
  0x63   : > { %2707 = vrot.lane.b32.xlu0 %v5851_v5, %s6554_s26  ;;  %2709 = vrot.lane.b32.xlu1 %v5857_v6, %s6554_s26 }
  0x67   : > { %2705 = vrot.lane.b32.xlu0 %v5843_v4, %s6554_s26  ;;  %2874 = vrot.lane.b32.xlu1 %v5851_v5, %s5664_s21 }
  0x6b   : > { %2876 = vrot.lane.b32.xlu0 %v5857_v6, %s5664_s21  ;;  %2872 = vrot.lane.b32.xlu1 %v5843_v4, %s5664_s21 }
  0x6f   : > { %3041 = vrot.lane.b32.xlu0 %v5851_v5, %s5665_s27  ;;  %3043 = vrot.lane.b32.xlu1 %v5857_v6, %s5665_s27 }
  0x73   : > { %3039 = vrot.lane.b32.xlu0 %v5843_v4, %s5665_s27  ;;  %3208 = vrot.lane.b32.xlu1 %v5851_v5, %s6549_s18 }
  0x77   : > { %3210 = vrot.lane.b32.xlu0 %v5857_v6, %s6549_s18  ;;  %3206 = vrot.lane.b32.xlu1 %v5843_v4, %s6549_s18 }
  0x8d   : > { %v405_v9 = vpop.permute.xlu1 %404  ;;  %v401_v10 = vpop.permute.xlu0 %400 }
  0x8e   : > { %v409_v16 = vsel %vm406_vm1, %v405_v9, %v401_v10 }
  0x91   : > { %v403_v11 = vpop.permute.xlu0 %402  ;;  %v387_v12 = vpop.permute.xlu1 %386 }
  0x92   : > { %v408_v14 = vsel %vm406_vm1, %v401_v10, %v403_v11  ;;  %v407_v15 = vsel %vm406_vm1, %v403_v11, %v405_v9 }
  0x93   : > { %5082 = vmatprep.subr.msk.mxu0 %vm414_vm2, %v408_v14  ;;  %5298 = vmatpush3.msk.msra.mxu1 %vm414_vm2, %v407_v15 }
  0x94   : > { %5083 = vmatpush1.msk.msra.mxu0 %vm414_vm2, %v409_v16  ;;  %5300 = vmatmul.mubr.msk.f32.vlgmr.msra.gmra.mrb[0].mxu1 %vm410_vm3, %v5081_v13 }
  0x95   : > { %5084 = vmatmul.mubr.msk.f32.vlgmr.msra.gmra.mrb[0].mxu0 %vm410_vm3, %v5081_v13  ;;  %v389_v17 = vpop.permute.xlu0 %388  ;;  %v391_v18 = vpop.permute.xlu1 %390  ;;  %5302 = vmatprep.subr.mxu1 %v5657_v0 }
  0x96   : > { %v396_v19 = vsel %vm394_vm4, %v387_v12, %v389_v17  ;;  %v395_v20 = vsel %vm394_vm4, %v389_v17, %v391_v18  ;;  %v397_v21 = vsel %vm394_vm4, %v391_v18, %v387_v12  ;;  %5304 = vmatprep.mubr.msk.f32.mxu1 %vm5658_vm0, %v5657_v0  ;;  %641 = vmatprep.mubr.f32.mxu0 %v5657_v0  ;;  %v5128_v12 = vld [vmem:[%s6537_s3 + $0x20] sm:$0xf] }
  0x97   : > { %5087 = vmatprep.subr.msk.mxu0 %vm414_vm2, %v396_v19  ;;  %5303 = vmatpush3.msk.msra.mxu1 %vm414_vm2, %v395_v20  ;;  %v5134_v19 = vld [vmem:[%s6538_s4 + $0x4] sm:$0xf] }
  0x98   : > { %5088 = vmatpush1.msk.msra.mxu0 %vm414_vm2, %v397_v21  ;;  %5307 = vmatprep.subr.mxu1 %v5657_v0 }
  0x99   : > { %v721_v22 = vpop.permute.xlu0 %720  ;;  %v723_v24 = vpop.permute.xlu1 %722 }
  0x9a   : > { %v728_v25 = vsel %vm726_vm5, %v721_v22, %v723_v24 }
  0x9b   : > { %5093 = vmatprep.subr.msk.mxu0 %vm414_vm2, %v728_v25  ;;  %v1883_v25 = vld [vmem:[%s6538_s4] sm:$0xf] }
  0x9c   : > { %5305 = vmatmul.mubr.msk.f32.vlgmr.msra.gmra.mrb[0].mxu1 %vm410_vm3, %v381_v23 }
  0x9d   : > { %5089 = vmatmul.mubr.msk.f32.vlgmr.msra.gmra.mrb[0].mxu0 %vm410_vm3, %v381_v23  ;;  %v725_v26 = vpop.permute.xlu0 %724  ;;  %v889_v27 = vpop.permute.xlu1 %888  ;;  %5309 = vmatprep.mubr.msk.f32.mxu1 %vm5658_vm0, %v5657_v0 }
  0x9e   : > { %v727_v28 = vsel %vm726_vm5, %v723_v24, %v725_v26  ;;  %v729_v29 = vsel %vm726_vm5, %v725_v26, %v721_v22  ;;  %806 = vmatprep.mubr.f32.mxu0 %v5657_v0 }
  0x9f   : > { %5094 = vmatpush1.msk.msra.mxu0 %vm414_vm2, %v729_v29  ;;  %5308 = vmatpush3.msk.msra.mxu1 %vm414_vm2, %v727_v28 }
  0xa0   : > { %5312 = vmatprep.subr.mxu1 %v5657_v0 }
  0xa1   : > { %v891_v31 = vpop.permute.xlu0 %890  ;;  %v893_v32 = vpop.permute.xlu1 %892 }
  0xa2   : > { %v896_v33 = vsel %vm894_vm6, %v889_v27, %v891_v31  ;;  %v895_v34 = vsel %vm894_vm6, %v891_v31, %v893_v32  ;;  %v897_v35 = vsel %vm894_vm6, %v893_v32, %v889_v27  ;;  %v5145_v32 = vld [vmem:[%s6538_s4 + $0x8] sm:$0xf] }
  0xa3   : > { %5099 = vmatprep.subr.msk.mxu0 %vm414_vm2, %v896_v33 }
  0xa4   : > { %5310 = vmatmul.mubr.msk.f32.vlgmr.msra.gmra.mrb[0].mxu1 %vm410_vm3, %v5092_v30 }
  0xa5   : > { %5095 = vmatmul.mubr.msk.f32.vlgmr.msra.gmra.mrb[0].mxu0 %vm410_vm3, %v5092_v30  ;;  %5313 = vmatpush3.msk.msra.mxu1 %vm414_vm2, %v895_v34  ;;  %v1214_v36 = vpop.permute.xlu0 %1213  ;;  %v1216_v38 = vpop.permute.xlu1 %1215 }
  0xa6   : > { %5100 = vmatpush1.msk.msra.mxu0 %vm414_vm2, %v897_v35  ;;  %5314 = vmatprep.mubr.msk.f32.mxu1 %vm5658_vm0, %v5657_v0  ;;  %v1218_v39 = vsel %vm1217_vm7, %v1214_v36, %v1216_v38 }
  0xa7   : > { %974 = vmatprep.mubr.f32.mxu0 %v5657_v0  ;;  %5317 = vmatprep.subr.mxu1 %v5657_v0 }
  0xa8   : > { %5105 = vmatprep.subr.msk.mxu0 %vm414_vm2, %v5796_v3 }
  0xa9   : > { %v1212_v40 = vpop.permute.xlu0 %1211  ;;  %v1382_v41 = vpop.permute.xlu1 %1381 }
  0xaa   : > { %v1220_v44 = vsel %vm1217_vm7, %v1216_v38, %v1212_v40  ;;  %v1219_v45 = vsel %vm1217_vm7, %v1212_v40, %v1214_v36  ;;  %v5151_v36 = vld [vmem:[%s6538_s4 + $0xc] sm:$0xf]  ;;  %v5157_v40 = vld [vmem:[%s6538_s4 + $0x10] sm:$0xf] }
  0xac   : > { %5315 = vmatmul.mubr.msk.f32.vlgmr.msra.gmra.mrb[0].mxu1 %vm410_vm3, %v5098_v37 }
  0xad   : > { %5101 = vmatmul.mubr.msk.f32.vlgmr.msra.gmra.mrb[0].mxu0 %vm410_vm3, %v5098_v37  ;;  %5318 = vmatpush3.msk.msra.mxu1 %vm414_vm2, %v5786_v1  ;;  %v1384_v43 = vpop.permute.xlu0 %1383  ;;  %v1380_v47 = vpop.permute.xlu1 %1379 }
  0xae   : > { %5319 = vmatprep.mubr.msk.f32.mxu1 %vm5658_vm0, %v5657_v0  ;;  %5106 = vmatpush1.msk.msra.mxu0 %vm414_vm2, %v5788_v2  ;;  %v1386_v46 = vsel %vm1385_vm8, %v1382_v41, %v1384_v43  ;;  %v1388_v51 = vsel %vm1385_vm8, %v1384_v43, %v1380_v47  ;;  %v1387_v52 = vsel %vm1385_vm8, %v1380_v47, %v1382_v41 }
  0xaf   : > { %1129 = vmatprep.mubr.f32.mxu0 %v5657_v0  ;;  %5111 = vmatprep.subr.msk.mxu0 %vm414_vm2, %v1218_v39 }
  0xb0   : > { %5322 = vmatprep.subr.mxu1 %v5657_v0 }
  0xb1   : > { %v1550_v48 = vpop.permute.xlu0 %1549  ;;  %v1552_v50 = vpop.permute.xlu1 %1551 }
  0xb2   : > { %v1554_v53 = vsel %vm1553_vm9, %v1550_v48, %v1552_v50 }
  0xb4   : > { %5320 = vmatmul.mubr.msk.f32.vlgmr.msra.gmra.mrb[0].mxu1 %vm410_vm3, %v5104_v42 }
  0xb5   : > { %5107 = vmatmul.mubr.msk.f32.vlgmr.msra.gmra.mrb[0].mxu0 %vm410_vm3, %v5104_v42  ;;  %5323 = vmatpush3.msk.msra.mxu1 %vm414_vm2, %v1220_v44  ;;  %v1548_v54 = vpop.permute.xlu0 %1547  ;;  %v1718_v55 = vpop.permute.xlu1 %1717 }
  0xb6   : > { %5112 = vmatpush1.msk.msra.mxu0 %vm414_vm2, %v1219_v45  ;;  %5324 = vmatprep.mubr.msk.f32.mxu1 %vm5658_vm0, %v5657_v0  ;;  %v1556_v58 = vsel %vm1553_vm9, %v1552_v50, %v1548_v54  ;;  %v1555_v59 = vsel %vm1553_vm9, %v1548_v54, %v1550_v48  ;;  %v5163_v45 = vld [vmem:[%s6538_s4 + $0x14] sm:$0xf] }
  0xb7   : > { %1297 = vmatprep.mubr.f32.mxu0 %v5657_v0  ;;  %5117 = vmatprep.subr.msk.mxu0 %vm414_vm2, %v1386_v46 }
  0xb8   : > { %5327 = vmatprep.subr.mxu1 %v5657_v0 }
  0xb9   : > { %v1720_v57 = vpop.permute.xlu0 %1719  ;;  %v1716_v61 = vpop.permute.xlu1 %1715 }
  0xba   : > { %v1722_v60 = vsel %vm1721_vm10, %v1718_v55, %v1720_v57  ;;  %v1724_v2 = vsel %vm1721_vm10, %v1720_v57, %v1716_v61  ;;  %v1723_v3 = vsel %vm1721_vm10, %v1716_v61, %v1718_v55  ;;  %v5181_v61 = vld [vmem:[%s6538_s4 + $0x20] sm:$0xf] }
  0xbc   : > { %5325 = vmatmul.mubr.msk.f32.vlgmr.msra.gmra.mrb[0].mxu1 %vm410_vm3, %v5110_v49 }
  0xbd   : > { %5113 = vmatmul.mubr.msk.f32.vlgmr.msra.gmra.mrb[0].mxu0 %vm410_vm3, %v5110_v49  ;;  %5328 = vmatpush3.msk.msra.mxu1 %vm414_vm2, %v1388_v51  ;;  %v1900_v62 = vpop.permute.xlu0 %1899  ;;  %v1902_v1 = vpop.permute.xlu1 %1901  ;;  %v5169_v51 = vld [vmem:[%s6538_s4 + $0x18] sm:$0xf] }
  0xbe   : > { %5118 = vmatpush1.msk.msra.mxu0 %vm414_vm2, %v1387_v52  ;;  %5329 = vmatprep.mubr.msk.f32.mxu1 %vm5658_vm0, %v5657_v0  ;;  %v1906_v9 = vsel %vm406_vm1, %v1900_v62, %v1902_v1 }
  0xbf   : > { %1465 = vmatprep.mubr.f32.mxu0 %v5657_v0  ;;  %5123 = vmatprep.subr.msk.mxu0 %vm414_vm2, %v1554_v53 }
  0xc0   : > { %5332 = vmatprep.subr.mxu1 %v5657_v0 }
  0xc1   : > { %v1904_v10 = vpop.permute.xlu0 %1903  ;;  %v1889_v11 = vpop.permute.xlu1 %1888 }
  0xc2   : > { %v1905_v14 = vsel %vm406_vm1, %v1902_v1, %v1904_v10  ;;  %v1907_v15 = vsel %vm406_vm1, %v1904_v10, %v1900_v62  ;;  %v3378_v62 = vshrl.u32 %v392_v7, 7  ;;  %v378_v1 = vld [vmem:[%s6536_s2] sm:$0x7] }
  0xc4   : > { %5330 = vmatmul.mubr.msk.f32.vlgmr.msra.gmra.mrb[0].mxu1 %vm410_vm3, %v5116_v56 }
  0xc5   : > { %5119 = vmatmul.mubr.msk.f32.vlgmr.msra.gmra.mrb[0].mxu0 %vm410_vm3, %v5116_v56  ;;  %5333 = vmatpush3.msk.msra.mxu1 %vm414_vm2, %v1556_v58  ;;  %v1891_v13 = vpop.permute.xlu0 %1890  ;;  %v1893_v17 = vpop.permute.xlu1 %1892  ;;  %v5175_v58 = vld [vmem:[%s6538_s4 + $0x1c] sm:$0xf] }
  0xc6   : > { %5124 = vmatpush1.msk.msra.mxu0 %vm414_vm2, %v1555_v59  ;;  %5334 = vmatprep.mubr.msk.f32.mxu1 %vm5658_vm0, %v5657_v0  ;;  %v1895_v16 = vsel %vm394_vm4, %v1889_v11, %v1891_v13  ;;  %v1894_v21 = vsel %vm394_vm4, %v1891_v13, %v1893_v17  ;;  %v1896_v22 = vsel %vm394_vm4, %v1893_v17, %v1889_v11 }
  0xc7   : > { %1633 = vmatprep.mubr.f32.mxu0 %v5657_v0  ;;  %5129 = vmatprep.subr.msk.mxu0 %vm414_vm2, %v1722_v60 }
  0xc8   : > { %5337 = vmatprep.subr.mxu1 %v5657_v0 }
  0xc9   : > { %v2217_v18 = vpop.permute.xlu0 %2216  ;;  %v2219_v20 = vpop.permute.xlu1 %2218 }
  0xca   : > { %v2223_v23 = vsel %vm726_vm5, %v2217_v18, %v2219_v20 }
  0xcc   : > { %5335 = vmatmul.mubr.msk.f32.vlgmr.msra.gmra.mrb[0].mxu1 %vm410_vm3, %v5122_v63 }
  0xcd   : > { %5125 = vmatmul.mubr.msk.f32.vlgmr.msra.gmra.mrb[0].mxu0 %vm410_vm3, %v5122_v63  ;;  %5338 = vmatpush3.msk.msra.mxu1 %vm414_vm2, %v1724_v2  ;;  %v2221_v24 = vpop.permute.xlu0 %2220  ;;  %v2384_v28 = vpop.permute.xlu1 %2383  ;;  %v3387_v63 = vsub.s32 2, %v3378_v62  ;;  %v3379_v2 = vsub.s32 0, %v3378_v62 }
  0xce   : > { %5130 = vmatpush1.msk.msra.mxu0 %vm414_vm2, %v1723_v3  ;;  %5339 = vmatprep.mubr.msk.f32.mxu1 %vm5658_vm0, %v5657_v0  ;;  %v2222_v27 = vsel %vm726_vm5, %v2219_v20, %v2221_v24  ;;  %v2224_v29 = vsel %vm726_vm5, %v2221_v24, %v2217_v18  ;;  %v3383_v3 = vsub.s32 1, %v3378_v62 }
  0xcf   : > { %1801 = vmatprep.mubr.f32.mxu0 %v5657_v0  ;;  %5135 = vmatprep.subr.msk.mxu0 %vm414_vm2, %v1906_v9  ;;  %v6236_v9 = vrot.slane %v378_v1, %v3387_v63  ;;  %v6238_v10 = vrot.slane %v378_v1, %v3379_v2 }
  0xd0   : > { %5342 = vmatprep.subr.mxu1 %v5657_v0  ;;  %v6240_v11 = vrot.slane %v378_v1, %v3383_v3 }
  0xd1   : > { %v2386_v26 = vpop.permute.xlu0 %2385  ;;  %v2388_v31 = vpop.permute.xlu1 %2387 }
  0xd2   : > { %v2390_v30 = vsel %vm894_vm6, %v2384_v28, %v2386_v26  ;;  %v2389_v33 = vsel %vm894_vm6, %v2386_v26, %v2388_v31  ;;  %v2391_v34 = vsel %vm894_vm6, %v2388_v31, %v2384_v28  ;;  %v5667_v31 = vmov 0  }
  0xd3   : > { %5585 = vset.pattern.permute.xlu0 %v5667_v31  ;;  %5586 = vset.pattern.permute.xlu1 %v5667_v31 }
  0xd4   : > { %5340 = vmatmul.mubr.msk.f32.vlgmr.msra.gmra.mrb[0].mxu1 %vm410_vm3, %v5128_v12 }
  0xd5   : > { %5131 = vmatmul.mubr.msk.f32.vlgmr.msra.gmra.mrb[0].mxu0 %vm410_vm3, %v5128_v12  ;;  %5343 = vmatpush3.msk.msra.mxu1 %vm414_vm2, %v1905_v14  ;;  %v2708_v35 = vpop.permute.xlu0 %2707  ;;  %v2710_v37 = vpop.permute.xlu1 %2709 }
  0xd6   : > { %5136 = vmatpush1.msk.msra.mxu0 %vm414_vm2, %v1907_v15  ;;  %5344 = vmatprep.mubr.msk.f32.mxu1 %vm5658_vm0, %v5657_v0  ;;  %v2711_v38 = vsel %vm1217_vm7, %v2708_v35, %v2710_v37 }
  0xd7   : > { %1984 = vmatprep.mubr.f32.mxu0 %v5657_v0  ;;  %5140 = vmatprep.subr.msk.mxu0 %vm414_vm2, %v1895_v16 }
  0xd8   : > { %5347 = vmatprep.subr.mxu1 %v5657_v0 }
  0xd9   : > { %v2706_v39 = vpop.permute.xlu0 %2705 }
  0xda   : > { %v2712_v42 = vsel %vm1217_vm7, %v2706_v39, %v2708_v35 }
  0xdc   : > { %5345 = vmatmul.mubr.msk.f32.vlgmr.msra.gmra.mrb[0].mxu1 %vm410_vm3, %v5134_v19 }
  0xdd   : > { %5137 = vmatmul.mubr.msk.f32.vlgmr.msra.gmra.mrb[0].mxu0 %vm410_vm3, %v5134_v19  ;;  %5348 = vmatpush3.msk.msra.mxu1 %vm414_vm2, %v1894_v21  ;;  %v2877_v41 = vpop.permute.xlu0 %2876 }
  0xde   : > { %5141 = vmatpush1.msk.msra.mxu0 %vm414_vm2, %v1896_v22  ;;  %5349 = vmatprep.mubr.msk.f32.mxu1 %vm5658_vm0, %v5657_v0 }
  0xdf   : > { %2137 = vmatprep.mubr.f32.mxu0 %v5657_v0  ;;  %5146 = vmatprep.subr.msk.mxu0 %vm414_vm2, %v2223_v23 }
  0xe0   : > { %5352 = vmatprep.subr.mxu1 %v5657_v0 }
  0xe1   : > { %v3042_v44 = vpop.permute.xlu0 %3041 }
  0xe4   : > { %5350 = vmatmul.mubr.msk.f32.vlgmr.msra.gmra.mrb[0].mxu1 %vm410_vm3, %v1883_v25 }
  0xe5   : > { %5142 = vmatmul.mubr.msk.f32.vlgmr.msra.gmra.mrb[0].mxu0 %vm410_vm3, %v1883_v25  ;;  %5353 = vmatpush3.msk.msra.mxu1 %vm414_vm2, %v2222_v27  ;;  %v3040_v50 = vpop.permute.xlu0 %3039 }
  0xe6   : > { %5147 = vmatpush1.msk.msra.mxu0 %vm414_vm2, %v2224_v29  ;;  %5354 = vmatprep.mubr.msk.f32.mxu1 %vm5658_vm0, %v5657_v0  ;;  %v3046_v55 = vsel %vm1553_vm9, %v3040_v50, %v3042_v44 }
  0xe7   : > { %2301 = vmatprep.mubr.f32.mxu0 %v5657_v0  ;;  %5152 = vmatprep.subr.msk.mxu0 %vm414_vm2, %v2390_v30 }
  0xe8   : > { %5357 = vmatprep.subr.mxu1 %v5657_v0 }
  0xe9   : > { %v3211_v52 = vpop.permute.xlu0 %3210 }
  0xec   : > { %5355 = vmatmul.mubr.msk.f32.vlgmr.msra.gmra.mrb[0].mxu1 %vm410_vm3, %v5145_v32 }
  0xed   : > { %5148 = vmatmul.mubr.msk.f32.vlgmr.msra.gmra.mrb[0].mxu0 %vm410_vm3, %v5145_v32  ;;  %5358 = vmatpush3.msk.msra.mxu1 %vm414_vm2, %v2389_v33 }
  0xee   : > { %5153 = vmatpush1.msk.msra.mxu0 %vm414_vm2, %v2391_v34  ;;  %5359 = vmatprep.mubr.msk.f32.mxu1 %vm5658_vm0, %v5657_v0 }
  0xef   : > { %2468 = vmatprep.mubr.f32.mxu0 %v5657_v0  ;;  %5362 = vmatprep.subr.mxu1 %v5657_v0 }
  0xf0   : > { %5158 = vmatprep.subr.msk.mxu0 %vm414_vm2, %v5851_v5  ;;  %v2875_v5 = vpop.permute.xlu1 %2874 }
  0xf4   : > { %5360 = vmatmul.mubr.msk.f32.vlgmr.msra.gmra.mrb[0].mxu1 %vm410_vm3, %v5151_v36  ;;  %v2873_v43 = vpop.permute.xlu1 %2872 }
  0xf5   : > { %5154 = vmatmul.mubr.msk.f32.vlgmr.msra.gmra.mrb[0].mxu0 %vm410_vm3, %v5151_v36  ;;  %5363 = vmatpush3.msk.msra.mxu1 %vm414_vm2, %v5857_v6  ;;  %v2713_v6 = vsel %vm1217_vm7, %v2710_v37, %v2706_v39  ;;  %v2880_v47 = vsel %vm1385_vm8, %v2877_v41, %v2873_v43  ;;  %v2879_v48 = vsel %vm1385_vm8, %v2873_v43, %v2875_v5  ;;  %v3374_v39 = vld [vmem:[%s6539_s5] sm:$0xf] }
  0xf6   : > { %5364 = vmatprep.mubr.msk.f32.mxu1 %vm5658_vm0, %v5657_v0  ;;  %5159 = vmatpush1.msk.msra.mxu0 %vm414_vm2, %v5843_v4  ;;  %v2878_v4 = vsel %vm1385_vm8, %v2875_v5, %v2877_v41  ;;  %v3375_v41 = vld [vmem:[%s6540_s6] sm:$0xf] }
  0xf7   : > { %2623 = vmatprep.mubr.f32.mxu0 %v5657_v0  ;;  %5164 = vmatprep.subr.msk.mxu0 %vm414_vm2, %v2711_v38 }
  0xf8   : > { %5367 = vmatprep.subr.mxu1 %v5657_v0  ;;  %v3044_v46 = vpop.permute.xlu1 %3043 }
  0xf9   : > { %v3045_v49 = vsel %vm1553_vm9, %v3042_v44, %v3044_v46  ;;  %v3047_v53 = vsel %vm1553_vm9, %v3044_v46, %v3040_v50 }
  0xfc   : > { %5365 = vmatmul.mubr.msk.f32.vlgmr.msra.gmra.mrb[0].mxu1 %vm410_vm3, %v5157_v40  ;;  %v3209_v54 = vpop.permute.xlu1 %3208 }
  0xfd   : > { %5160 = vmatmul.mubr.msk.f32.vlgmr.msra.gmra.mrb[0].mxu0 %vm410_vm3, %v5157_v40  ;;  %5368 = vmatpush3.msk.msra.mxu1 %vm414_vm2, %v2713_v6  ;;  %v3212_v56 = vsel %vm1721_vm10, %v3209_v54, %v3211_v52 }
  0xfe   : > { %5165 = vmatpush1.msk.msra.mxu0 %vm414_vm2, %v2712_v42  ;;  %5369 = vmatprep.mubr.msk.f32.mxu1 %vm5658_vm0, %v5657_v0 }
  0xff   : > { %2790 = vmatprep.mubr.f32.mxu0 %v5657_v0  ;;  %5170 = vmatprep.subr.msk.mxu0 %vm414_vm2, %v2878_v4 }
 0x100   : > { %5372 = vmatprep.subr.mxu1 %v5657_v0  ;;  %v3207_v57 = vpop.permute.xlu1 %3206 }
 0x101   : > { %v3214_v59 = vsel %vm1721_vm10, %v3211_v52, %v3207_v57  ;;  %v3213_v60 = vsel %vm1721_vm10, %v3207_v57, %v3209_v54 }
 0x104   : > { %5370 = vmatmul.mubr.msk.f32.vlgmr.msra.gmra.mrb[0].mxu1 %vm410_vm3, %v5163_v45 }
 0x105   : > { %5166 = vmatmul.mubr.msk.f32.vlgmr.msra.gmra.mrb[0].mxu0 %vm410_vm3, %v5163_v45  ;;  %5373 = vmatpush3.msk.msra.mxu1 %vm414_vm2, %v2880_v47 }
 0x106   : > { %5171 = vmatpush1.msk.msra.mxu0 %vm414_vm2, %v2879_v48  ;;  %5374 = vmatprep.mubr.msk.f32.mxu1 %vm5658_vm0, %v5657_v0 }
 0x107   : > { %2957 = vmatprep.mubr.f32.mxu0 %v5657_v0  ;;  %5176 = vmatprep.subr.msk.mxu0 %vm414_vm2, %v3045_v49 }
 0x108   : > { %5377 = vmatprep.subr.mxu1 %v5657_v0 }
 0x10c   : > { %5375 = vmatmul.mubr.msk.f32.vlgmr.msra.gmra.mrb[0].mxu1 %vm410_vm3, %v5169_v51 }
 0x10d   : > { %5172 = vmatmul.mubr.msk.f32.vlgmr.msra.gmra.mrb[0].mxu0 %vm410_vm3, %v5169_v51  ;;  %5378 = vmatpush3.msk.msra.mxu1 %vm414_vm2, %v3047_v53 }
 0x10e   : > { %5177 = vmatpush1.msk.msra.mxu0 %vm414_vm2, %v3046_v55  ;;  %5379 = vmatprep.mubr.msk.f32.mxu1 %vm5658_vm0, %v5657_v0 }
 0x10f   : > { %3124 = vmatprep.mubr.f32.mxu0 %v5657_v0  ;;  %5182 = vmatprep.subr.msk.mxu0 %vm414_vm2, %v3212_v56 }
 0x110   : > { %5382 = vmatprep.subr.mxu1 %v5657_v0 }
 0x114   : > { %5380 = vmatmul.mubr.msk.f32.vlgmr.msra.gmra.mrb[0].mxu1 %vm410_vm3, %v5175_v58 }
 0x115   : > { %5178 = vmatmul.mubr.msk.f32.vlgmr.msra.gmra.mrb[0].mxu0 %vm410_vm3, %v5175_v58  ;;  %5383 = vmatpush3.msk.msra.mxu1 %vm414_vm2, %v3214_v59 }
 0x116   : > { %5183 = vmatpush1.msk.msra.mxu0 %vm414_vm2, %v3213_v60  ;;  %5384 = vmatprep.mubr.msk.f32.mxu1 %vm5658_vm0, %v5657_v0  ;;  %v5187_v60 = vld [vmem:[%s6541_s7 + $0x4] sm:$0xf] }
 0x117   : > { %3291 = vmatprep.mubr.f32.mxu0 %v5657_v0  ;;  %5387 = vmatprep.subr.mxu1 %v5657_v0 }
 0x11c   : > { %5385 = vmatmul.mubr.msk.f32.vlgmr.msra.gmra.mrb[0].mxu1 %vm410_vm3, %v5181_v61 }
 0x11d   : > { %5184 = vmatmul.mubr.msk.f32.vlgmr.msra.gmra.mrb[0].mxu0 %vm410_vm3, %v5181_v61  ;;  %5389 = vmatprep.mubr.msk.f32.mxu1 %vm5658_vm0, %v5657_v0 }
 0x11e   : > { %3540 = vmatprep.mubr.f32.mxu0 %v5657_v0 }
 0x1ef   : > { %v3364_v12 = vpop.f32.mrb[0].mxu1 }
 0x1f0   : > { %v3394_v13 = vmul.f32 %v6236_v9, %v3364_v12  ;;  %v3293_v14 = vpop.f32.mrb[0].mxu0  ;;  %v5386_v15 = vpop.f32.mrb[1].mxu1 }
 0x1f1   : > { %v3392_v7 = vmul.f32 %v6238_v10, %v3293_v14  ;;  %v3295_v16 = vpop.f32.mrb[1].mxu0 }
 0x1f2   : > { %v3393_v17 = vmul.f32 %v6240_v11, %v3295_v16  ;;  %v3405_v20 = vmul.f32 %v3394_v13, %v3364_v12  ;;  %v3398_v25 = vsel %vm414_vm2, %v3394_v13, 0.0  ;;  %v3443_v13 = vld [vmem:[%s6541_s7] sm:$0xf] }
 0x1f3   : > { %v3403_v18 = vmul.f32 %v3392_v7, %v3293_v14  ;;  %v3395_v19 = vsel %vm414_vm2, %v3392_v7, 0.0 }
 0x1f4   : > { %v3404_v21 = vmul.f32 %v3393_v17, %v3295_v16  ;;  %v3396_v22 = vsel %vm414_vm2, %v3393_v17, 0.0  ;;  %v3409_v29 = vsel %vm414_vm2, %v3405_v20, 0.0 }
 0x1f5   : > { %v3397_v23 = vadd.f32 %v3396_v22, %v3395_v19  ;;  %v3406_v24 = vsel %vm414_vm2, %v3403_v18, 0.0  ;;  %v5198_v22 = vld [vmem:[%s6541_s7 + $0x8] sm:$0xf] }
 0x1f6   : > { %v3407_v26 = vsel %vm414_vm2, %v3404_v21, 0.0 }
 0x1f7   : > { %v3399_v27 = vadd.f32 %v3398_v25, %v3397_v23  ;;  %v3408_v28 = vadd.f32 %v3407_v26, %v3406_v24 }
 0x1f9   : > { %3400 = vadd.xlane.f32.xlu0 %v3399_v27  ;;  %v3410_v30 = vadd.f32 %v3409_v29, %v3408_v28  ;;  %v5204_v29 = vld [vmem:[%s6541_s7 + $0xc] sm:$0xf] }
 0x1fb   : > { %3411 = vadd.xlane.f32.xlu1 %v3410_v30 }
 0x286   : > { %v3401_v32 = vpop.xlane.xlu0 %3400 }
 0x287   : > { %v3402_v33 = vmul.f32 0.00390625, %v3401_v32 }
 0x288   : > { %v3412_v34 = vpop.xlane.xlu1 %3411 }
 0x289   : > { %v3414_v35 = vmul.f32 %v3402_v33, %v3402_v33  ;;  %v3413_v36 = vmul.f32 0.00390625, %v3412_v34 }
 0x28b   : > { %v3415_v37 = vsub.f32 %v3413_v36, %v3414_v35 }
 0x28d   : > { %v3416_v38 = vadd.f32 1e-05, %v3415_v37 }
 0x28f   : > { %5589 = vrsqrt.f32 %v3416_v38 }
 0x299   : > { %v5590_v5 = vpop.eup %5589 }
 0x29a   : > { %v3418_v40 = vmul.f32 %v5590_v5, %v3374_v39  ;;  %v5216_v5 = vld [vmem:[%s6541_s7 + $0x14] sm:$0xf] }
 0x29c   : > { %3423 = vperm.xlu0 %5585, %v3418_v40   ;;  %v3419_v6 = vmul.f32 %v3418_v40, %v3402_v33  ;;  %v5210_v33 = vld [vmem:[%s6541_s7 + $0x10] sm:$0xf] }
 0x29e   : > { %v3420_v42 = vsub.f32 %v3375_v41, %v3419_v6 }
 0x2a0   : > { %3431 = vperm.xlu1 %5586, %v3420_v42  }
 0x31b   : > { %v3424_v4 = vpop.permute.xlu0 %3423 }
 0x31c   : > { %v3426_v43 = vmul.f32 %v3424_v4, %v3293_v14  ;;  %v3427_v44 = vmul.f32 %v3424_v4, %v3295_v16  ;;  %v3428_v45 = vmul.f32 %v3424_v4, %v3364_v12 }
 0x31f   : > { %v3432_v46 = vpop.permute.xlu1 %3431 }
 0x320   : > { %v3434_v47 = vadd.f32 %v3432_v46, %v3426_v43  ;;  %v3435_v48 = vadd.f32 %v3432_v46, %v3427_v44  ;;  %v3436_v49 = vadd.f32 %v3432_v46, %v3428_v45  ;;  %v5222_v43 = vld [vmem:[%s6541_s7 + $0x18] sm:$0xf] }
 0x322   : > { %v3437_v50 = vmax.f32 %v3434_v47, 0.0  ;;  %v3438_v51 = vmax.f32 %v3435_v48, 0.0  ;;  %v3439_v52 = vmax.f32 %v3436_v49, 0.0 }
 0x324   : > { %v6258_v53 = vmul.f32 %v3437_v50, %v6238_v10  ;;  %v6265_v54 = vmul.f32 %v3438_v51, %v6240_v11  ;;  %v6268_v55 = vmul.f32 %v3439_v52, %v6236_v9  ;;  %v5228_v50 = vld [vmem:[%s6541_s7 + $0x1c] sm:$0xf] }
 0x326   : > { %3772 = vrot.lane.b32.xlu0 %v6258_v53, %s5661_s12  ;;  %3455 = vrot.lane.b32.xlu1 %v6258_v53, %s5659_s30 }
 0x32a   : > { %3776 = vrot.lane.b32.xlu0 %v6268_v55, %s5661_s12  ;;  %3457 = vrot.lane.b32.xlu1 %v6265_v54, %s5659_s30 }
 0x32e   : > { %3941 = vrot.lane.b32.xlu0 %v6265_v54, %s6553_s25  ;;  %3459 = vrot.lane.b32.xlu1 %v6268_v55, %s5659_s30  ;;  %s6555_s30 = smov 109  }
 0x332   : > { %4266 = vrot.lane.b32.xlu0 %v6265_v54, %s6554_s26  ;;  %3444 = vrot.lane.b32.xlu1 %v6258_v53, %s5660_s11 }
 0x336   : > { %4264 = vrot.lane.b32.xlu0 %v6258_v53, %s6554_s26  ;;  %3446 = vrot.lane.b32.xlu1 %v6265_v54, %s5660_s11 }
 0x33a   : > { %4435 = vrot.lane.b32.xlu0 %v6268_v55, %s5664_s21  ;;  %3448 = vrot.lane.b32.xlu1 %v6268_v55, %s5660_s11  ;;  %s365_s11 = sand.u32 1, %s5647_s14  }
 0x33e   : > { %4600 = vrot.lane.b32.xlu0 %v6265_v54, %s5665_s27  ;;  %3774 = vrot.lane.b32.xlu1 %v6265_v54, %s5661_s12  ;;  %s5532_s12 = smul.u32 12, %s365_s11 }
 0x342   : > { %4598 = vrot.lane.b32.xlu0 %v6258_v53, %s5665_s27  ;;  %3939 = vrot.lane.b32.xlu1 %v6258_v53, %s6553_s25 }
 0x346   : > { %4769 = vrot.lane.b32.xlu0 %v6268_v55, %s6555_s30  ;;  %3943 = vrot.lane.b32.xlu1 %v6268_v55, %s6553_s25 }
 0x34a   : > { %4268 = vrot.lane.b32.xlu1 %v6268_v55, %s6554_s26 }
 0x34e   : > { %4433 = vrot.lane.b32.xlu1 %v6265_v54, %s5664_s21 }
 0x352   : > { %4431 = vrot.lane.b32.xlu1 %v6258_v53, %s5664_s21  ;;  %s5534_s21 = smul.u32 192, %s5745_s17  ;;  %s4990_s17 = scalar_lea.sflag [#allocation3], %s365_s11 }
 0x354   : > { %s6492_s28 = scalar_lea.hbm %s6544_s10, %s5534_s21 }
 0x356   : > { %4602 = vrot.lane.b32.xlu1 %v6268_v55, %s5665_s27  ;;  %s367_s27 = scalar_lea.vmem [#allocation2], %s5532_s12 }
 0x357   : > { %s5004_s25 = sshll.u32 %s367_s27, 4  ;;  %s6494_s25 = int_to_ptr.vmem [resolvable:$true] %s5004_s25 }
 0x358   : > { %s5593_s29 = scalar_lea.vmem %s6494_s25, 192 }
 0x359   : > { %p5594_p11 = scmp.ne.s32.totalorder %s6494_s25, %s5593_s29 }
 0x35a   : > { %4767 = vrot.lane.b32.xlu1 %v6265_v54, %s6555_s30 }
 0x35b   : > { %p5595_p12 = pnand %p5594_p11, %p5762_p5 }
 0x35d   : > { %p5596_p13 = pneg %p5595_p12 }
 0x35e   : > { %4765 = vrot.lane.b32.xlu1 %v6258_v53, %s6555_s30  ;;  %s5597_s30 = sshll.u32 %s5668_s20, 4  ;;  %s5598_s30 = int_to_ptr.vmem [resolvable:$false] %s5597_s30 }
 0x35f   : > { %s5599_s12 = scalar_lea.vmem %s5598_s30, 384  ;;  %p5600_p0 = scmp.lt.s32.totalorder %s6494_s25, %s5598_s30 }
 0x360   : > { %p5601_p1 = scmp.lt.s32.totalorder %s5599_s12, %s5593_s29 }
 0x362   : > { %p5602_p2 = por %p5601_p1, %p5600_p0 }
 0x364   : > { %p5603_p3 = pnand %p5602_p2, %p5596_p13 }
 0x398   : > { %v3456_v56 = vpop.permute.xlu1 %3455  ;;  %v3773_v1 = vpop.permute.xlu0 %3772 }
 0x39c   : > { %v3458_v57 = vpop.permute.xlu1 %3457  ;;  %v3777_v14 = vpop.permute.xlu0 %3776 }
 0x39d   : > { %v3462_v58 = vsel %vm406_vm1, %v3456_v56, %v3458_v57  ;;  %v3780_v19 = vsel %vm726_vm5, %v3777_v14, %v3773_v1 }
 0x39e   : > { %5188 = vmatprep.subr.msk.mxu0 %vm414_vm2, %v3462_v58 }
 0x3a0   : > { %v3460_v59 = vpop.permute.xlu1 %3459  ;;  %v3942_v20 = vpop.permute.xlu0 %3941 }
 0x3a1   : > { %v3461_v61 = vsel %vm406_vm1, %v3458_v57, %v3460_v59  ;;  %v3463_v62 = vsel %vm406_vm1, %v3460_v59, %v3456_v56 }
 0x3a2   : > { %5189 = vmatpush1.msk.msra.mxu0 %vm414_vm2, %v3463_v62  ;;  %5388 = vmatpush3.msk.msra.mxu1 %vm414_vm2, %v3461_v61 }
 0x3a3   : > { %5190 = vmatmul.mubr.msk.f32.vlgmr.msra.gmra.mrb[2].mxu0 %vm410_vm3, %v5187_v60  ;;  %5390 = vmatmul.mubr.msk.f32.vlgmr.msra.gmra.mrb[2].mxu1 %vm410_vm3, %v5187_v60 }
 0x3a4   : > { %v3445_v63 = vpop.permute.xlu1 %3444  ;;  %5392 = vmatprep.subr.mxu1 %v5657_v0  ;;  %3693 = vmatprep.mubr.f32.mxu0 %v5657_v0  ;;  %v4267_v25 = vpop.permute.xlu0 %4266 }
 0x3a5   : > { %5394 = vmatprep.mubr.msk.f32.mxu1 %vm5658_vm0, %v5657_v0 }
 0x3a8   : > { %v3447_v2 = vpop.permute.xlu1 %3446  ;;  %v4265_v30 = vpop.permute.xlu0 %4264 }
 0x3a9   : > { %v3451_v3 = vsel %vm394_vm4, %v3445_v63, %v3447_v2  ;;  %v4271_v35 = vsel %vm1217_vm7, %v4265_v30, %v4267_v25 }
 0x3aa   : > { %5193 = vmatprep.subr.msk.mxu0 %vm414_vm2, %v3451_v3 }
 0x3ac   : > { %v3449_v12 = vpop.permute.xlu1 %3448  ;;  %v4436_v34 = vpop.permute.xlu0 %4435 }
 0x3ad   : > { %v3450_v15 = vsel %vm394_vm4, %v3447_v2, %v3449_v12  ;;  %v3452_v7 = vsel %vm394_vm4, %v3449_v12, %v3445_v63 }
 0x3ae   : > { %5194 = vmatpush1.msk.msra.mxu0 %vm414_vm2, %v3452_v7  ;;  %5393 = vmatpush3.msk.msra.mxu1 %vm414_vm2, %v3450_v15 }
 0x3af   : > { %5195 = vmatmul.mubr.msk.f32.vlgmr.msra.gmra.mrb[2].mxu0 %vm410_vm3, %v3443_v13  ;;  %5395 = vmatmul.mubr.msk.f32.vlgmr.msra.gmra.mrb[2].mxu1 %vm410_vm3, %v3443_v13 }
 0x3b0   : > { %v3775_v16 = vpop.permute.xlu1 %3774  ;;  %5397 = vmatprep.subr.mxu1 %v5657_v0  ;;  %3857 = vmatprep.mubr.f32.mxu0 %v5657_v0  ;;  %v4601_v39 = vpop.permute.xlu0 %4600 }
 0x3b1   : > { %v3778_v17 = vsel %vm726_vm5, %v3775_v16, %v3777_v14  ;;  %v3779_v18 = vsel %vm726_vm5, %v3773_v1, %v3775_v16  ;;  %5399 = vmatprep.mubr.msk.f32.mxu1 %vm5658_vm0, %v5657_v0 }
 0x3b2   : > { %5199 = vmatprep.subr.msk.mxu0 %vm414_vm2, %v3779_v18  ;;  %5398 = vmatpush3.msk.msra.mxu1 %vm414_vm2, %v3778_v17 }
 0x3b3   : > { %5200 = vmatpush1.msk.msra.mxu0 %vm414_vm2, %v3780_v19  ;;  %5402 = vmatprep.subr.mxu1 %v5657_v0 }
 0x3b4   : > { %v3940_v21 = vpop.permute.xlu1 %3939  ;;  %v4599_v4 = vpop.permute.xlu0 %4598 }
 0x3b5   : > { %v3946_v23 = vsel %vm894_vm6, %v3940_v21, %v3942_v20  ;;  %v4605_v45 = vsel %vm1553_vm9, %v4599_v4, %v4601_v39 }
 0x3b6   : > { %5205 = vmatprep.subr.msk.mxu0 %vm414_vm2, %v3946_v23  ;;  %v4930_v23 = vld [vmem:[%s6542_s8] sm:$0xf] }
 0x3b7   : > { %5201 = vmatmul.mubr.msk.f32.vlgmr.msra.gmra.mrb[2].mxu0 %vm410_vm3, %v5198_v22  ;;  %5400 = vmatmul.mubr.msk.f32.vlgmr.msra.gmra.mrb[2].mxu1 %vm410_vm3, %v5198_v22 }
 0x3b8   : > { %v3944_v24 = vpop.permute.xlu1 %3943  ;;  %4024 = vmatprep.mubr.f32.mxu0 %v5657_v0  ;;  %5404 = vmatprep.mubr.msk.f32.mxu1 %vm5658_vm0, %v5657_v0  ;;  %v4770_v46 = vpop.permute.xlu0 %4769 }
 0x3b9   : > { %v3945_v26 = vsel %vm894_vm6, %v3942_v20, %v3944_v24  ;;  %v3947_v27 = vsel %vm894_vm6, %v3944_v24, %v3940_v21 }
 0x3ba   : > { %5206 = vmatpush1.msk.msra.mxu0 %vm414_vm2, %v3947_v27  ;;  %5403 = vmatpush3.msk.msra.mxu1 %vm414_vm2, %v3945_v26  ;;  %v4931_v26 = vld [vmem:[%s6543_s9] sm:$0xf] }
 0x3bb   : > { %5211 = vmatprep.subr.msk.mxu0 %vm414_vm2, %v6265_v54  ;;  %5407 = vmatprep.subr.mxu1 %v5657_v0 }
 0x3bc   : > { %v4269_v28 = vpop.permute.xlu1 %4268 }
 0x3bd   : > { %v4270_v31 = vsel %vm1217_vm7, %v4267_v25, %v4269_v28  ;;  %v4272_v36 = vsel %vm1217_vm7, %v4269_v28, %v4265_v30 }
 0x3bf   : > { %5207 = vmatmul.mubr.msk.f32.vlgmr.msra.gmra.mrb[2].mxu0 %vm410_vm3, %v5204_v29  ;;  %5405 = vmatmul.mubr.msk.f32.vlgmr.msra.gmra.mrb[2].mxu1 %vm410_vm3, %v5204_v29 }
 0x3c0   : > { %5212 = vmatpush1.msk.msra.mxu0 %vm414_vm2, %v6258_v53  ;;  %5408 = vmatpush3.msk.msra.mxu1 %vm414_vm2, %v6268_v55  ;;  %v4434_v32 = vpop.permute.xlu1 %4433  ;;  %v5234_v53 = vld [vmem:[%s6541_s7 + $0x20] sm:$0xf] }
 0x3c1   : > { %5217 = vmatprep.subr.msk.mxu0 %vm414_vm2, %v4270_v31  ;;  %4182 = vmatprep.mubr.f32.mxu0 %v5657_v0  ;;  %v4437_v38 = vsel %vm1385_vm8, %v4434_v32, %v4436_v34 }
 0x3c2   : > { %5409 = vmatprep.mubr.msk.f32.mxu1 %vm5658_vm0, %v5657_v0  ;;  %5412 = vmatprep.subr.mxu1 %v5657_v0 }
 0x3c4   : > { %v4432_v37 = vpop.permute.xlu1 %4431 }
 0x3c5   : > { %v4438_v41 = vsel %vm1385_vm8, %v4432_v37, %v4434_v32  ;;  %v4439_v6 = vsel %vm1385_vm8, %v4436_v34, %v4432_v37 }
 0x3c7   : > { %5213 = vmatmul.mubr.msk.f32.vlgmr.msra.gmra.mrb[2].mxu0 %vm410_vm3, %v5210_v33  ;;  %5410 = vmatmul.mubr.msk.f32.vlgmr.msra.gmra.mrb[2].mxu1 %vm410_vm3, %v5210_v33 }
 0x3c8   : > { %5218 = vmatpush1.msk.msra.mxu0 %vm414_vm2, %v4271_v35  ;;  %5413 = vmatpush3.msk.msra.mxu1 %vm414_vm2, %v4272_v36  ;;  %v4603_v40 = vpop.permute.xlu1 %4602 }
 0x3c9   : > { %5223 = vmatprep.subr.msk.mxu0 %vm414_vm2, %v4437_v38  ;;  %4349 = vmatprep.mubr.f32.mxu0 %v5657_v0  ;;  %v4604_v42 = vsel %vm1553_vm9, %v4601_v39, %v4603_v40  ;;  %v4606_v47 = vsel %vm1553_vm9, %v4603_v40, %v4599_v4 }
 0x3ca   : > { %5414 = vmatprep.mubr.msk.f32.mxu1 %vm5658_vm0, %v5657_v0  ;;  %5417 = vmatprep.subr.mxu1 %v5657_v0 }
 0x3cc   : > { %v4768_v44 = vpop.permute.xlu1 %4767 }
 0x3cd   : > { %v4771_v48 = vsel %vm1721_vm10, %v4768_v44, %v4770_v46 }
 0x3cf   : > { %5219 = vmatmul.mubr.msk.f32.vlgmr.msra.gmra.mrb[2].mxu0 %vm410_vm3, %v5216_v5  ;;  %5415 = vmatmul.mubr.msk.f32.vlgmr.msra.gmra.mrb[2].mxu1 %vm410_vm3, %v5216_v5 }
 0x3d0   : > { %5224 = vmatpush1.msk.msra.mxu0 %vm414_vm2, %v4438_v41  ;;  %5418 = vmatpush3.msk.msra.mxu1 %vm414_vm2, %v4439_v6  ;;  %v4766_v49 = vpop.permute.xlu1 %4765 }
 0x3d1   : > { %5229 = vmatprep.subr.msk.mxu0 %vm414_vm2, %v4604_v42  ;;  %4516 = vmatprep.mubr.f32.mxu0 %v5657_v0  ;;  %v4772_v51 = vsel %vm1721_vm10, %v4766_v49, %v4768_v44  ;;  %v4773_v52 = vsel %vm1721_vm10, %v4770_v46, %v4766_v49 }
 0x3d2   : > { %5419 = vmatprep.mubr.msk.f32.mxu1 %vm5658_vm0, %v5657_v0  ;;  %5422 = vmatprep.subr.mxu1 %v5657_v0 }
 0x3d7   : > { %5225 = vmatmul.mubr.msk.f32.vlgmr.msra.gmra.mrb[2].mxu0 %vm410_vm3, %v5222_v43  ;;  %5420 = vmatmul.mubr.msk.f32.vlgmr.msra.gmra.mrb[2].mxu1 %vm410_vm3, %v5222_v43 }
 0x3d8   : > { %5230 = vmatpush1.msk.msra.mxu0 %vm414_vm2, %v4605_v45  ;;  %5423 = vmatpush3.msk.msra.mxu1 %vm414_vm2, %v4606_v47 }
 0x3d9   : > { %5235 = vmatprep.subr.msk.mxu0 %vm414_vm2, %v4771_v48  ;;  %4683 = vmatprep.mubr.f32.mxu0 %v5657_v0 }
 0x3da   : > { %5424 = vmatprep.mubr.msk.f32.mxu1 %vm5658_vm0, %v5657_v0  ;;  %5427 = vmatprep.subr.mxu1 %v5657_v0 }
 0x3df   : > { %5231 = vmatmul.mubr.msk.f32.vlgmr.msra.gmra.mrb[2].mxu0 %vm410_vm3, %v5228_v50  ;;  %5425 = vmatmul.mubr.msk.f32.vlgmr.msra.gmra.mrb[2].mxu1 %vm410_vm3, %v5228_v50 }
 0x3e0   : > { %5236 = vmatpush1.msk.msra.mxu0 %vm414_vm2, %v4772_v51  ;;  %5428 = vmatpush3.msk.msra.mxu1 %vm414_vm2, %v4773_v52 }
 0x3e1   : > { %4850 = vmatprep.mubr.f32.mxu0 %v5657_v0  ;;  %5429 = vmatprep.mubr.msk.f32.mxu1 %vm5658_vm0, %v5657_v0 }
 0x3e7   : > { %5237 = vmatmul.mubr.msk.f32.vlgmr.msra.gmra.mrb[2].mxu0 %vm410_vm3, %v5234_v53  ;;  %5430 = vmatmul.mubr.msk.f32.vlgmr.msra.gmra.mrb[2].mxu1 %vm410_vm3, %v5234_v53 }
 0x4ba   : > { %v4852_v8 = vpop.f32.mrb[2].mxu0  ;;  %v4923_v54 = vpop.f32.mrb[2].mxu1 }
 0x4bb   : > { %v4932_v55 = vmul.f32 %v4852_v8, %v6238_v10  ;;  %v4934_v56 = vmul.f32 %v4923_v54, %v6236_v9  ;;  %v4854_v57 = vpop.f32.mrb[3].mxu0  ;;  %v5431_v58 = vpop.f32.mrb[3].mxu1 }
 0x4bc   : > { %v4933_v59 = vmul.f32 %v4854_v57, %v6240_v11 }
 0x4bd   : > { %v4943_v60 = vmul.f32 %v4932_v55, %v4852_v8  ;;  %v4935_v0 = vsel %vm414_vm2, %v4932_v55, 0.0  ;;  %v4945_v61 = vmul.f32 %v4934_v56, %v4923_v54  ;;  %v4938_v12 = vsel %vm414_vm2, %v4934_v56, 0.0 }
 0x4be   : > { %v4936_v62 = vsel %vm414_vm2, %v4933_v59, 0.0  ;;  %v4944_v63 = vmul.f32 %v4933_v59, %v4854_v57 }
 0x4bf   : > { %v4937_v1 = vadd.f32 %v4936_v62, %v4935_v0  ;;  %v4946_v2 = vsel %vm414_vm2, %v4943_v60, 0.0  ;;  %v4949_v15 = vsel %vm414_vm2, %v4945_v61, 0.0 }
 0x4c0   : > { %v4947_v3 = vsel %vm414_vm2, %v4944_v63, 0.0 }
 0x4c1   : > { %v4939_v13 = vadd.f32 %v4938_v12, %v4937_v1  ;;  %v4948_v14 = vadd.f32 %v4947_v3, %v4946_v2 }
 0x4c3   : > { %4940 = vadd.xlane.f32.xlu0 %v4939_v13  ;;  %v4950_v7 = vadd.f32 %v4949_v15, %v4948_v14 }
 0x4c5   : > { %4951 = vadd.xlane.f32.xlu1 %v4950_v7 }
 0x550   : > { %v4941_v16 = vpop.xlane.xlu0 %4940 }
 0x551   : > { %v4942_v17 = vmul.f32 0.00390625, %v4941_v16 }
 0x552   : > { %v4952_v18 = vpop.xlane.xlu1 %4951 }
 0x553   : > { %v4954_v19 = vmul.f32 %v4942_v17, %v4942_v17  ;;  %v4953_v20 = vmul.f32 0.00390625, %v4952_v18 }
 0x555   : > { %v4955_v21 = vsub.f32 %v4953_v20, %v4954_v19 }
 0x557   : > { %v4956_v22 = vadd.f32 1e-05, %v4955_v21 }
 0x559   : > { %5591 = vrsqrt.f32 %v4956_v22 }
 0x563   : > { %v5592_v24 = vpop.eup %5591 }
 0x564   : > { %v4958_v25 = vmul.f32 %v5592_v24, %v4930_v23 }
 0x566   : > { %4963 = vperm.xlu0 %5585, %v4958_v25   ;;  %v4959_v27 = vmul.f32 %v4958_v25, %v4942_v17 }
 0x568   : > { %v4960_v28 = vsub.f32 %v4931_v26, %v4959_v27 }
 0x56a   : > { %4971 = vperm.xlu1 %5586, %v4960_v28  }
 0x5e5   : > { %v4964_v29 = vpop.permute.xlu0 %4963 }
 0x5e6   : > { %v4966_v30 = vmul.f32 %v4964_v29, %v4852_v8  ;;  %v4967_v31 = vmul.f32 %v4964_v29, %v4854_v57  ;;  %v4968_v32 = vmul.f32 %v4964_v29, %v4923_v54 }
 0x5e9   : > { %v4972_v33 = vpop.permute.xlu1 %4971 }
 0x5ea   : > { %v4974_v34 = vadd.f32 %v4972_v33, %v4966_v30  ;;  %v4975_v35 = vadd.f32 %v4972_v33, %v4967_v31  ;;  %v4976_v36 = vadd.f32 %v4972_v33, %v4968_v32 }
 0x5ec   : > { %v4977_v37 = vmax.f32 %v4974_v34, 0.0  ;;  %v4978_v38 = vmax.f32 %v4975_v35, 0.0  ;;  %v4979_v39 = vmax.f32 %v4976_v36, 0.0 }
 0x5ee   : > { %v4980_v5 = vmul.f32 %v4977_v37, %v6238_v10  ;;  %v4981_v40 = vmul.f32 %v4978_v38, %v6240_v11  ;;  %v4982_v41 = vmul.f32 %v4979_v39, %v6236_v9 }
 0x5f0   : > { %v4985_v6 = vcombine.low %v4980_v5, %v4981_v40  ;;  %4988 = vst [vmem:[%s367_s27 + $0x8] sm:$0xf] %v4982_v41 }
 0x5f2   : > { %4987 = vst [vmem:[%s367_s27] sm:$0xff] %v4985_v6 }
 0x5f3   : > { %5606 = shalt.err (!%p5603_p3)
}
 0x5f4   : > { %s5607_s11 = scalar_lea.hbm %s6492_s28, 192  ;;  %s5611_s26 = scalar_lea.hbm %s6544_s10, 384 }
 0x5f5   : > { %p5608_p4 = scmp.ne.s32.totalorder %s6492_s28, %s5607_s11  ;;  %p5612_p9 = scmp.lt.u32.totalorder %s6492_s28, %s6544_s10 }
 0x5f6   : > { %p5613_p10 = scmp.lt.u32.totalorder %s5611_s26, %s5607_s11  ;;  %p5615_p12 = scmp.lt.u32.totalorder %s5607_s11, %s6492_s28 }
 0x5f7   : > { %p5609_p7 = pnand %p5608_p4, %p5762_p5 }
 0x5f8   : > { %p5614_p11 = por %p5613_p10, %p5612_p9 }
 0x5f9   : > { %p5610_p8 = pneg %p5609_p7 }
 0x5fa   : > { %p5616_p13 = por %p5615_p12, %p5614_p11 }
 0x5fc   : > { %p5617_p0 = pnand %p5616_p13, %p5610_p8 }
 0x5fe   : > { %5620 = shalt.err (!%p5617_p0)
}
 0x5ff   : > { %5535 = dma.vmem_to_hbm [thread:$0]  (%p5762_p5), %s6494_s25, 192, %s6492_s28, %s4990_s17  }
 0x600 PF: > { %p5541_p1 = scmp.ge.s32.totalorder %s5655_s16, 2  ;;  %s5016_s29 = sand.u32 1, %s5643_s13  }
 0x601   : > { %s5017_s30 = scalar_lea.sflag [#allocation3], %s5016_s29 }
 0x602   : > { %p5538_p2 = pnand %p5541_p1, %p5766_p6 }
 0x604   : > { %5638 = dma.done.wait (!%p5538_p2), %s5017_s30, 192  }
 0x605   : > { %5640 = vsyncadd (!%p5538_p2), %s5017_s30, 4294967104  ;;  %p20_p3 = scmp.ge.s32.totalorder %s5749_s19, 4   ;;  %s6556_s13 = smov %s5647_s14 }
 0x606   : > { %s6557_s14 = smov %s5651_s15  ;;  %s6558_s15 = smov %s5760_s22 }
 0x607   : > { %s6559_s16 = smov %s5749_s19  ;;  %22 = sbr.rel (!%p20_p3) target bundleno = 3 (0x3), region = 122 }
 0x60e   :  { %5022 = vsyncpa [#allocation3], 1 }
 0x60f   :  { %5024 = vsyncpa [#allocation3 + $0x1], 1 }

</bundles_post_ra>
